<compile_context>
chip_gen: v5e
topology: v5e:2x2
jax: 0.10.0
libtpu: 0.0.40
codegen_flags: <defaults>
</compile_context>

<pallas_src>
import functools

import jax
import jax.numpy as jnp
from jax import lax
from jax.experimental import pallas as pl
from jax.experimental.pallas import tpu as pltpu


def _round_up(v, m):
    return (v + m - 1) // m * m


def net3d_local_kernel(
    # resident inputs (constant block index -> stay resident in VMEM)
    x_ref, d_ref, s_src_ref, s_dst_ref, s_dst_t_ref,
    w_in_ref, b_in_ref, w_ein_ref, b_ein_ref,
    wo1_ref, bo1_ref, wo2_ref, bo2_ref,
    # per-layer soft-edge gate bias, whole (depth,) vector resident in SMEM
    bs_ref,
    # per-layer weights (streamed along the layer grid axis)
    wm1sd_ref, wm1e_ref, bm1_ref, wm2_ref, bm2_ref,
    ws_ref, wu1_ref, bu1_ref, wu2_ref, bu2_ref,
    # output
    out_ref,
    # scratch (persists across grid iterations)
    feat_ref, dh_ref,
    *, n_edges,
):
    silu = jax.nn.silu
    f32 = jnp.float32
    bf16 = jnp.bfloat16

    layer = pl.program_id(0)
    ep, hp = dh_ref.shape           # padded edge count, padded hidden dim

    if ep != n_edges:
        edge_mask = (lax.broadcasted_iota(jnp.int32, (ep, 1), 0)
                     < n_edges).astype(f32)
    else:
        edge_mask = None

    # ------------------- layer 0: input node / edge MLPs -------------------
    @pl.when(layer == 0)
    def _init():
        # input node MLP (1 layer, last_activation=SiLU) + extra SiLU from
        # input_node_func.
        h = jnp.dot(x_ref[...].astype(bf16), w_in_ref[...],
                    preferred_element_type=f32) + b_in_ref[...]
        feat_ref[...] = silu(silu(h))
        # input edge MLP: edge_in_dim == 1 -> the Linear is a broadcast mul.
        dh0 = silu(silu(d_ref[...] * w_ein_ref[...] + b_ein_ref[...]))
        dh_ref[...] = dh0 if edge_mask is None else dh0 * edge_mask

    # ------------------------ message passing layer ------------------------
    # Node-granularity projection with the fused [W_src | W_dst] weight.
    feat_bf = feat_ref[...].astype(bf16)
    nproj = jnp.dot(feat_bf, wm1sd_ref[0],
                    preferred_element_type=f32)                       # (N, 2H)
    nproj_bf = nproj.astype(bf16)

    # Gather as MXU incidence matmuls (replaces the per-edge serial loop):
    #   gath[e] = nproj[src[e], :H] + nproj[dst[e], H:]
    gath = (jnp.dot(s_src_ref[...], nproj_bf[:, :hp],
                    preferred_element_type=f32)
            + jnp.dot(s_dst_ref[...], nproj_bf[:, hp:],
                      preferred_element_type=f32))                    # (E, H)

    # Edge-side projection of the persistent edge state d_h.
    eproj = jnp.dot(dh_ref[...].astype(bf16), wm1e_ref[0],
                    preferred_element_type=f32)                       # (E, H)

    # message_network: Linear(3H,H)+SiLU, Linear(H,H)+SiLU
    h1 = silu(gath + eproj + bm1_ref[0])
    msg = silu(jnp.dot(h1.astype(bf16), wm2_ref[0],
                       preferred_element_type=f32) + bm2_ref[0])      # (E, H)

    # edges.data['d'] += message  (persists across layers; padded rows stay 0)
    dh_ref[...] = dh_ref[...] + (msg if edge_mask is None
                                 else msg * edge_mask)

    # soft edge gate via lane reduction (XLU); scalar bias comes from SMEM
    ew = jax.nn.sigmoid(jnp.sum(msg * ws_ref[0], axis=-1, keepdims=True)
                        + bs_ref[layer])                              # (E, 1)
    m = msg * ew

    # scatter-sum via MXU: msum = S_dst^T @ m  (padded edges are zero columns)
    msum = jnp.dot(s_dst_t_ref[...], m.astype(bf16),
                   preferred_element_type=f32)                        # (N, H)

    # update_network: Linear+SiLU, Linear (last_activation='None'); residual
    u_in = msum + feat_ref[...]
    u1 = silu(jnp.dot(u_in.astype(bf16), wu1_ref[0],
                      preferred_element_type=f32) + bu1_ref[0])
    h_new = jnp.dot(u1.astype(bf16), wu2_ref[0],
                    preferred_element_type=f32) + bu2_ref[0]
    feat_ref[...] = h_new + feat_ref[...]

    # ----------------- last layer: node-wise output network ----------------
    @pl.when(layer == pl.num_programs(0) - 1)
    def _finalize():
        o1 = silu(jnp.dot(feat_ref[...].astype(bf16), wo1_ref[...],
                          preferred_element_type=f32) + bo1_ref[...])
        out_ref[...] = jnp.dot(o1.astype(bf16), wo2_ref[...],
                               preferred_element_type=f32) + bo2_ref[...]


def net3d_local(x, d, src, dst, p, *, depth, hidden_dim, target_dim):
    """Pads/packs parameters, launches the kernel, slices the padding off."""
    n, node_dim = x.shape
    e = d.shape[0]
    f32, bf16 = jnp.float32, jnp.bfloat16

    HP = _round_up(hidden_dim, 128)       # lane-dense hidden dim
    TP = _round_up(target_dim, 128)       # lane-dense output dim
    DP = _round_up(node_dim, 128)         # lane-dense input feature dim
    NP = _round_up(n, 8)                  # sublane-aligned node count
    EP = _round_up(e, 8)                  # sublane-aligned edge count

    def pad2(a, r, c, dtype=f32):
        z = jnp.zeros((r, c), dtype)
        return z.at[:a.shape[0], :a.shape[1]].set(a.astype(dtype))

    def pad3(a, r, c, dtype=f32):
        z = jnp.zeros((a.shape[0], r, c), dtype)
        return z.at[:, :a.shape[1], :a.shape[2]].set(a.astype(dtype))

    # graph tensors
    x_p = pad2(x, NP, DP)
    d_p = pad2(d, EP, 1)

    # one-hot incidence matrices (bf16, exact) for MXU gather / scatter;
    # padded edges become zero rows (gather) / zero columns (scatter).
    src_i = src.astype(jnp.int32)
    dst_i = dst.astype(jnp.int32)
    node_iota = jnp.arange(NP, dtype=jnp.int32)
    s_src_full = (src_i[:, None] == node_iota[None, :]).astype(bf16)   # (E, NP)
    s_dst_full = (dst_i[:, None] == node_iota[None, :]).astype(bf16)   # (E, NP)
    s_src = pad2(s_src_full, EP, NP, bf16)
    s_dst = pad2(s_dst_full, EP, NP, bf16)
    s_dst_t = pad2(s_dst_full.T, NP, EP, bf16)

    # weights (matmul operands -> bf16, biases / gate row -> f32)
    w_in = pad2(p["w_in"], DP, HP, bf16)
    b_in = pad2(p["b_in"], 1, HP)
    w_ein = pad2(p["w_ein"], 1, HP)
    b_ein = pad2(p["b_ein"], 1, HP)

    wm1sd = jnp.concatenate([pad3(p["wm1s"], HP, HP, bf16),
                             pad3(p["wm1d"], HP, HP, bf16)], axis=2)   # (L,HP,2HP)
    wm1e = pad3(p["wm1e"], HP, HP, bf16)
    bm1 = pad3(p["bm1"], 1, HP)
    wm2 = pad3(p["wm2"], HP, HP, bf16)
    bm2 = pad3(p["bm2"], 1, HP)
    ws = pad3(jnp.transpose(p["ws"], (0, 2, 1)), 1, HP)                # (L,1,HP)
    bs_vec = p["bs"].reshape(depth).astype(f32)                        # (L,) SMEM
    wu1 = pad3(p["wu1"], HP, HP, bf16)
    bu1 = pad3(p["bu1"], 1, HP)
    wu2 = pad3(p["wu2"], HP, HP, bf16)
    bu2 = pad3(p["bu2"], 1, HP)
    wo1 = pad2(p["wo1"], HP, HP, bf16)
    bo1 = pad2(p["bo1"], 1, HP)
    wo2 = pad2(p["wo2"], HP, TP, bf16)
    bo2 = pad2(p["bo2"], 1, TP)

    def const_spec(shape):
        return pl.BlockSpec(shape, lambda l: (0,) * len(shape))

    def layer_spec(shape):
        return pl.BlockSpec((1,) + shape, lambda l: (l, 0, 0))

    in_specs = [
        const_spec((NP, DP)),            # x
        const_spec((EP, 1)),             # d
        const_spec((EP, NP)),            # s_src
        const_spec((EP, NP)),            # s_dst
        const_spec((NP, EP)),            # s_dst_t
        const_spec((DP, HP)),            # w_in
        const_spec((1, HP)),             # b_in
        const_spec((1, HP)),             # w_ein
        const_spec((1, HP)),             # b_ein
        const_spec((HP, HP)),            # wo1
        const_spec((1, HP)),             # bo1
        const_spec((HP, TP)),            # wo2
        const_spec((1, TP)),             # bo2
        pl.BlockSpec(memory_space=pltpu.MemorySpace.SMEM),   # bs (depth,)
        layer_spec((HP, 2 * HP)),        # wm1sd
        layer_spec((HP, HP)),            # wm1e
        layer_spec((1, HP)),             # bm1
        layer_spec((HP, HP)),            # wm2
        layer_spec((1, HP)),             # bm2
        layer_spec((1, HP)),             # ws
        layer_spec((HP, HP)),            # wu1
        layer_spec((1, HP)),             # bu1
        layer_spec((HP, HP)),            # wu2
        layer_spec((1, HP)),             # bu2
    ]

    scratch_shapes = [
        pltpu.VMEM((NP, HP), f32),       # feat (residual stream)
        pltpu.VMEM((EP, HP), f32),       # d_h  (persistent edge state)
    ]

    grid_spec = pltpu.PrefetchScalarGridSpec(
        num_scalar_prefetch=0,
        grid=(depth,),
        in_specs=in_specs,
        out_specs=pl.BlockSpec((NP, TP), lambda l: (0, 0)),
        scratch_shapes=scratch_shapes,
    )

    operands = (x_p, d_p, s_src, s_dst, s_dst_t, w_in, b_in, w_ein, b_ein,
                wo1, bo1, wo2, bo2, bs_vec,
                wm1sd, wm1e, bm1, wm2, bm2, ws, wu1, bu1, wu2, bu2)

    # Size the VMEM request from the actual footprint (clamped so it also fits
    # v7x's 64 MiB per-TC VMEM), instead of requesting a blanket 64 MiB.
    resident_ops = (x_p, d_p, s_src, s_dst, s_dst_t, w_in, b_in, w_ein, b_ein,
                    wo1, bo1, wo2, bo2)
    streamed_ops = (wm1sd, wm1e, bm1, wm2, bm2, ws, wu1, bu1, wu2, bu2)
    resident_bytes = sum(int(a.size) * a.dtype.itemsize for a in resident_ops)
    layer_block_bytes = sum(int(a.size) * a.dtype.itemsize
                            for a in streamed_ops) // depth
    scratch_bytes = (NP * HP + EP * HP) * 4
    out_bytes = NP * TP * 4
    vmem_need = 2 * (resident_bytes + layer_block_bytes + out_bytes) \
        + scratch_bytes
    vmem_limit = int(min(48 * 1024 * 1024,
                         max(16 * 1024 * 1024, 4 * vmem_need)))

    flops = int(
        2 * NP * DP * HP
        + depth * (2 * NP * HP * 2 * HP            # node projection
                   + 2 * 2 * EP * NP * HP          # gather matmuls
                   + 2 * EP * HP * HP              # edge projection
                   + 2 * EP * HP * HP              # message layer 2
                   + 2 * NP * EP * HP              # scatter matmul
                   + 2 * 2 * NP * HP * HP)         # update network
        + 2 * NP * HP * HP + 2 * NP * HP * TP)     # output MLP
    transcendentals = int(depth * (3 * EP * HP + EP + 2 * NP * HP)
                          + 4 * NP * HP + 2 * EP * HP)
    bytes_accessed = int(sum(int(op.size) * op.dtype.itemsize
                             for op in operands) + out_bytes)

    out = pl.pallas_call(
        functools.partial(net3d_local_kernel, n_edges=e),
        out_shape=jax.ShapeDtypeStruct((NP, TP), f32),
        grid_spec=grid_spec,
        compiler_params=pltpu.CompilerParams(
            dimension_semantics=("arbitrary",),   # layers are sequential
            vmem_limit_bytes=vmem_limit,
        ),
        cost_estimate=pl.CostEstimate(flops=flops,
                                      transcendentals=transcendentals,
                                      bytes_accessed=bytes_accessed),
    )(*operands)

    return out[:n, :target_dim]


def reference(x, d, src, dst, p, *, depth):
    """Pure-JAX f32 reference mirroring the PyTorch/DGL semantics."""
    silu = jax.nn.silu
    feat = silu(silu(x @ p["w_in"] + p["b_in"]))
    d_h = silu(silu(d * p["w_ein"] + p["b_ein"]))
    for l in range(depth):
        mi = jnp.concatenate([feat[src], feat[dst], d_h], axis=-1)
        wm1 = jnp.concatenate([p["wm1s"][l], p["wm1d"][l], p["wm1e"][l]], axis=0)
        h1 = silu(mi @ wm1 + p["bm1"][l])
        msg = silu(h1 @ p["wm2"][l] + p["bm2"][l])
        d_h = d_h + msg
        ew = jax.nn.sigmoid(msg @ p["ws"][l] + p["bs"][l])
        m = msg * ew
        m_sum = jnp.zeros_like(feat).at[dst].add(m)
        u1 = silu((m_sum + feat) @ p["wu1"][l] + p["bu1"][l])
        feat = (u1 @ p["wu2"][l] + p["bu2"][l]) + feat
    o1 = silu(feat @ p["wo1"] + p["bo1"])
    return o1 @ p["wo2"] + p["bo2"]


if __name__ == "__main__":
    # Small graph consistent with the module (non-multiples of 8 to exercise
    # the padding/masking paths).
    N, E = 12, 30                    # nodes, directed edges
    node_dim, hidden, target_dim = 4, 32, 8
    depth = 4                        # propagation_depth

    key = jax.random.PRNGKey(0)
    ks = list(jax.random.split(key, 32))

    def rnd(k, shape, fan_in):
        return jax.random.normal(k, shape, jnp.float32) / jnp.sqrt(float(fan_in))

    x = jax.random.normal(ks[0], (N, node_dim), jnp.float32)
    d = jax.random.uniform(ks[1], (E, 1), jnp.float32, 0.5, 3.0)
    src = jax.random.randint(ks[22], (E,), 0, N)
    dst = jax.random.randint(ks[23], (E,), 0, N)

    H, L = hidden, depth
    p = {
        "w_in":  rnd(ks[2], (node_dim, H), node_dim),
        "b_in":  rnd(ks[3], (1, H), 1),
        "w_ein": rnd(ks[4], (1, H), 1),
        "b_ein": rnd(ks[5], (1, H), 1),
        "wm1s":  rnd(ks[6], (L, H, H), 3 * H),
        "wm1d":  rnd(ks[7], (L, H, H), 3 * H),
        "wm1e":  rnd(ks[8], (L, H, H), 3 * H),
        "bm1":   rnd(ks[9], (L, 1, H), 1),
        "wm2":   rnd(ks[10], (L, H, H), H),
        "bm2":   rnd(ks[11], (L, 1, H), 1),
        "ws":    rnd(ks[12], (L, H, 1), H),
        "bs":    rnd(ks[13], (L, 1, 1), 1),
        "wu1":   rnd(ks[14], (L, H, H), H),
        "bu1":   rnd(ks[15], (L, 1, H), 1),
        "wu2":   rnd(ks[16], (L, H, H), H),
        "bu2":   rnd(ks[17], (L, 1, H), 1),
        "wo1":   rnd(ks[18], (H, H), H),
        "bo1":   rnd(ks[19], (1, H), 1),
        "wo2":   rnd(ks[20], (H, target_dim), H),
        "bo2":   rnd(ks[21], (1, target_dim), 1),
    }

    out = net3d_local(x, d, src, dst, p, depth=depth,
                      hidden_dim=hidden, target_dim=target_dim)
    out = jax.block_until_ready(out)

    ref = reference(x, d, src, dst, p, depth=depth)
    assert out.shape == (N, target_dim)
    err = float(jnp.max(jnp.abs(out - ref)))
    scale = float(jnp.max(jnp.abs(ref)))
    # bf16 matmul operands with f32 accumulation -> a few % worst-case error.
    assert err <= 5e-2 * (1.0 + scale), (err, scale)

    print("KERNEL_OK")
</pallas_src>

<mosaic_0001>
module attributes {stable_mosaic.version = 11 : i64} {
  func.func @net3d_local_kernel(%arg0: i32, %arg1: memref<16x128xf32, #tpu.memory_space<vmem>>, %arg2: memref<32x1xf32, #tpu.memory_space<vmem>>, %arg3: memref<32x16xbf16, #tpu.memory_space<vmem>>, %arg4: memref<32x16xbf16, #tpu.memory_space<vmem>>, %arg5: memref<16x32xbf16, #tpu.memory_space<vmem>>, %arg6: memref<128x128xbf16, #tpu.memory_space<vmem>>, %arg7: memref<1x128xf32, #tpu.memory_space<vmem>>, %arg8: memref<1x128xf32, #tpu.memory_space<vmem>>, %arg9: memref<1x128xf32, #tpu.memory_space<vmem>>, %arg10: memref<128x128xbf16, #tpu.memory_space<vmem>>, %arg11: memref<1x128xf32, #tpu.memory_space<vmem>>, %arg12: memref<128x128xbf16, #tpu.memory_space<vmem>>, %arg13: memref<1x128xf32, #tpu.memory_space<vmem>>, %arg14: memref<4xf32, #tpu.memory_space<smem>>, %arg15: memref<1x128x256xbf16, #tpu.memory_space<vmem>>, %arg16: memref<1x128x128xbf16, #tpu.memory_space<vmem>>, %arg17: memref<1x1x128xf32, #tpu.memory_space<vmem>>, %arg18: memref<1x128x128xbf16, #tpu.memory_space<vmem>>, %arg19: memref<1x1x128xf32, #tpu.memory_space<vmem>>, %arg20: memref<1x1x128xf32, #tpu.memory_space<vmem>>, %arg21: memref<1x128x128xbf16, #tpu.memory_space<vmem>>, %arg22: memref<1x1x128xf32, #tpu.memory_space<vmem>>, %arg23: memref<1x128x128xbf16, #tpu.memory_space<vmem>>, %arg24: memref<1x1x128xf32, #tpu.memory_space<vmem>>, %arg25: memref<16x128xf32, #tpu.memory_space<vmem>>, %arg26: memref<16x128xf32, #tpu.memory_space<vmem>>, %arg27: memref<32x128xf32, #tpu.memory_space<vmem>>) attributes {dimension_semantics = [#tpu.dimension_semantics<arbitrary>], iteration_bounds = array<i64: 4>, scalar_prefetch = 0 : i64, scratch_operands = 2 : i64, tpu.core_type = #tpu.core_type<tc>, window_params = [{pipeline_mode = #tpu.pipeline_mode<synchronous>, transform_indices = @transform_0, window_bounds = array<i64: 16, 128>}, {pipeline_mode = #tpu.pipeline_mode<synchronous>, transform_indices = @transform_1, window_bounds = array<i64: 32, 1>}, {pipeline_mode = #tpu.pipeline_mode<synchronous>, transform_indices = @transform_2, window_bounds = array<i64: 32, 16>}, {pipeline_mode = #tpu.pipeline_mode<synchronous>, transform_indices = @transform_3, window_bounds = array<i64: 32, 16>}, {pipeline_mode = #tpu.pipeline_mode<synchronous>, transform_indices = @transform_4, window_bounds = array<i64: 16, 32>}, {pipeline_mode = #tpu.pipeline_mode<synchronous>, transform_indices = @transform_5, window_bounds = array<i64: 128, 128>}, {pipeline_mode = #tpu.pipeline_mode<synchronous>, transform_indices = @transform_6, window_bounds = array<i64: 1, 128>}, {pipeline_mode = #tpu.pipeline_mode<synchronous>, transform_indices = @transform_7, window_bounds = array<i64: 1, 128>}, {pipeline_mode = #tpu.pipeline_mode<synchronous>, transform_indices = @transform_8, window_bounds = array<i64: 1, 128>}, {pipeline_mode = #tpu.pipeline_mode<synchronous>, transform_indices = @transform_9, window_bounds = array<i64: 128, 128>}, {pipeline_mode = #tpu.pipeline_mode<synchronous>, transform_indices = @transform_10, window_bounds = array<i64: 1, 128>}, {pipeline_mode = #tpu.pipeline_mode<synchronous>, transform_indices = @transform_11, window_bounds = array<i64: 128, 128>}, {pipeline_mode = #tpu.pipeline_mode<synchronous>, transform_indices = @transform_12, window_bounds = array<i64: 1, 128>}, {transform_indices = @transform_13, window_bounds = array<i64: 4>}, {transform_indices = @transform_14, window_bounds = array<i64: 1, 128, 256>}, {transform_indices = @transform_15, window_bounds = array<i64: 1, 128, 128>}, {transform_indices = @transform_16, window_bounds = array<i64: 1, 1, 128>}, {transform_indices = @transform_17, window_bounds = array<i64: 1, 128, 128>}, {transform_indices = @transform_18, window_bounds = array<i64: 1, 1, 128>}, {transform_indices = @transform_19, window_bounds = array<i64: 1, 1, 128>}, {transform_indices = @transform_20, window_bounds = array<i64: 1, 128, 128>}, {transform_indices = @transform_21, window_bounds = array<i64: 1, 1, 128>}, {transform_indices = @transform_22, window_bounds = array<i64: 1, 128, 128>}, {transform_indices = @transform_23, window_bounds = array<i64: 1, 1, 128>}, {pipeline_mode = #tpu.pipeline_mode<synchronous>, transform_indices = @transform_24, window_bounds = array<i64: 16, 128>}]} {
    %0 = tpu.iota {dimensions = array<i32: 0>} : vector<32x1xi32>
    %c30_i32 = arith.constant 30 : i32
    %1 = vector.broadcast %c30_i32 : i32 to vector<32x1xi32>
    %2 = arith.cmpi slt, %0, %1 : vector<32x1xi32>
    %3 = arith.extui %2 : vector<32x1xi1> to vector<32x1xi32>
    %4 = arith.sitofp %3 : vector<32x1xi32> to vector<32x1xf32>
    %c0_i32 = arith.constant 0 : i32
    %5 = arith.cmpi eq, %arg0, %c0_i32 : i32
    %6 = arith.extui %5 : i1 to i32
    %c0_i32_0 = arith.constant 0 : i32
    %7 = arith.cmpi ne, %6, %c0_i32_0 : i32
    scf.if %7 {
      %c0_63 = arith.constant 0 : index
      %c0_64 = arith.constant 0 : index
      %106 = vector.load %arg1[%c0_63, %c0_64] : memref<16x128xf32, #tpu.memory_space<vmem>>, vector<16x128xf32>
      %107 = arith.truncf %106 : vector<16x128xf32> to vector<16x128xbf16>
      %c0_65 = arith.constant 0 : index
      %c0_66 = arith.constant 0 : index
      %108 = vector.load %arg6[%c0_65, %c0_66] : memref<128x128xbf16, #tpu.memory_space<vmem>>, vector<128x128xbf16>
      %cst_67 = arith.constant dense<0.000000e+00> : vector<16x128xf32>
      %109 = tpu.matmul %107, %108, %cst_67 {dimension_numbers = #tpu.dot_dimension_numbers<[1], [0], [0], [1], [0, 0, 1, 1], [], []>} : vector<16x128xbf16>, vector<128x128xbf16>, vector<16x128xf32> -> vector<16x128xf32>
      %c0_68 = arith.constant 0 : index
      %c0_69 = arith.constant 0 : index
      %110 = vector.load %arg7[%c0_68, %c0_69] : memref<1x128xf32, #tpu.memory_space<vmem>>, vector<1x128xf32>
      %111 = vector.broadcast %110 : vector<1x128xf32> to vector<16x128xf32>
      %112 = arith.addf %109, %111 : vector<16x128xf32>
      %113 = arith.negf %112 : vector<16x128xf32>
      %114 = math.exp %113 : vector<16x128xf32>
      %cst_70 = arith.constant 1.000000e+00 : f32
      %115 = vector.broadcast %cst_70 : f32 to vector<16x128xf32>
      %116 = arith.addf %115, %114 : vector<16x128xf32>
      %117 = arith.divf %115, %116 : vector<16x128xf32>
      %118 = arith.mulf %112, %117 : vector<16x128xf32>
      %119 = arith.negf %118 : vector<16x128xf32>
      %120 = math.exp %119 : vector<16x128xf32>
      %cst_71 = arith.constant 1.000000e+00 : f32
      %121 = vector.broadcast %cst_71 : f32 to vector<16x128xf32>
      %122 = arith.addf %121, %120 : vector<16x128xf32>
      %123 = arith.divf %121, %122 : vector<16x128xf32>
      %124 = arith.mulf %118, %123 : vector<16x128xf32>
      %c0_72 = arith.constant 0 : index
      %c0_73 = arith.constant 0 : index
      %125 = vector.load %arg26[%c0_72, %c0_73] : memref<16x128xf32, #tpu.memory_space<vmem>>, vector<16x128xf32>
      tpu.vector_store %arg26[%c0_72, %c0_73], %124 {strides = array<i32>} : memref<16x128xf32, #tpu.memory_space<vmem>>, vector<16x128xf32>,
      %c0_74 = arith.constant 0 : index
      %c0_75 = arith.constant 0 : index
      %126 = vector.load %arg2[%c0_74, %c0_75] : memref<32x1xf32, #tpu.memory_space<vmem>>, vector<32x1xf32>
      %c0_76 = arith.constant 0 : index
      %c0_77 = arith.constant 0 : index
      %127 = vector.load %arg8[%c0_76, %c0_77] : memref<1x128xf32, #tpu.memory_space<vmem>>, vector<1x128xf32>
      %128 = vector.broadcast %126 : vector<32x1xf32> to vector<32x128xf32>
      %129 = vector.broadcast %127 : vector<1x128xf32> to vector<32x128xf32>
      %130 = arith.mulf %128, %129 : vector<32x128xf32>
      %c0_78 = arith.constant 0 : index
      %c0_79 = arith.constant 0 : index
      %131 = vector.load %arg9[%c0_78, %c0_79] : memref<1x128xf32, #tpu.memory_space<vmem>>, vector<1x128xf32>
      %132 = vector.broadcast %131 : vector<1x128xf32> to vector<32x128xf32>
      %133 = arith.addf %130, %132 : vector<32x128xf32>
      %134 = arith.negf %133 : vector<32x128xf32>
      %135 = math.exp %134 : vector<32x128xf32>
      %cst_80 = arith.constant 1.000000e+00 : f32
      %136 = vector.broadcast %cst_80 : f32 to vector<32x128xf32>
      %137 = arith.addf %136, %135 : vector<32x128xf32>
      %138 = arith.divf %136, %137 : vector<32x128xf32>
      %139 = arith.mulf %133, %138 : vector<32x128xf32>
      %140 = arith.negf %139 : vector<32x128xf32>
      %141 = math.exp %140 : vector<32x128xf32>
      %cst_81 = arith.constant 1.000000e+00 : f32
      %142 = vector.broadcast %cst_81 : f32 to vector<32x128xf32>
      %143 = arith.addf %142, %141 : vector<32x128xf32>
      %144 = arith.divf %142, %143 : vector<32x128xf32>
      %145 = arith.mulf %139, %144 : vector<32x128xf32>
      %146 = vector.broadcast %4 : vector<32x1xf32> to vector<32x128xf32>
      %147 = arith.mulf %145, %146 : vector<32x128xf32>
      %c0_82 = arith.constant 0 : index
      %c0_83 = arith.constant 0 : index
      %148 = vector.load %arg27[%c0_82, %c0_83] : memref<32x128xf32, #tpu.memory_space<vmem>>, vector<32x128xf32>
      tpu.vector_store %arg27[%c0_82, %c0_83], %147 {strides = array<i32>} : memref<32x128xf32, #tpu.memory_space<vmem>>, vector<32x128xf32>,
    } else {
    }
    %c0 = arith.constant 0 : index
    %c0_1 = arith.constant 0 : index
    %8 = vector.load %arg26[%c0, %c0_1] : memref<16x128xf32, #tpu.memory_space<vmem>>, vector<16x128xf32>
    %9 = arith.truncf %8 : vector<16x128xf32> to vector<16x128xbf16>
    %c0_2 = arith.constant 0 : index
    %c0_3 = arith.constant 0 : index
    %c0_4 = arith.constant 0 : index
    %10 = vector.load %arg15[%c0_2, %c0_3, %c0_4] : memref<1x128x256xbf16, #tpu.memory_space<vmem>>, vector<1x128x256xbf16>
    %11 = vector.shape_cast %10 : vector<1x128x256xbf16> to vector<128x256xbf16>
    %cst = arith.constant dense<0.000000e+00> : vector<16x256xf32>
    %12 = tpu.matmul %9, %11, %cst {dimension_numbers = #tpu.dot_dimension_numbers<[1], [0], [0], [1], [0, 0, 1, 1], [], []>} : vector<16x128xbf16>, vector<128x256xbf16>, vector<16x256xf32> -> vector<16x256xf32>
    %13 = arith.truncf %12 : vector<16x256xf32> to vector<16x256xbf16>
    %c0_5 = arith.constant 0 : index
    %c0_6 = arith.constant 0 : index
    %14 = vector.load %arg3[%c0_5, %c0_6] : memref<32x16xbf16, #tpu.memory_space<vmem>>, vector<32x16xbf16>
    %15 = vector.extract_strided_slice %13 {offsets = [0, 0], sizes = [16, 128], strides = [1, 1]} : vector<16x256xbf16> to vector<16x128xbf16>
    %cst_7 = arith.constant dense<0.000000e+00> : vector<32x128xf32>
    %16 = tpu.matmul %14, %15, %cst_7 {dimension_numbers = #tpu.dot_dimension_numbers<[1], [0], [0], [1], [0, 0, 1, 1], [], []>} : vector<32x16xbf16>, vector<16x128xbf16>, vector<32x128xf32> -> vector<32x128xf32>
    %c0_8 = arith.constant 0 : index
    %c0_9 = arith.constant 0 : index
    %17 = vector.load %arg4[%c0_8, %c0_9] : memref<32x16xbf16, #tpu.memory_space<vmem>>, vector<32x16xbf16>
    %18 = vector.extract_strided_slice %13 {offsets = [0, 128], sizes = [16, 128], strides = [1, 1]} : vector<16x256xbf16> to vector<16x128xbf16>
    %cst_10 = arith.constant dense<0.000000e+00> : vector<32x128xf32>
    %19 = tpu.matmul %17, %18, %cst_10 {dimension_numbers = #tpu.dot_dimension_numbers<[1], [0], [0], [1], [0, 0, 1, 1], [], []>} : vector<32x16xbf16>, vector<16x128xbf16>, vector<32x128xf32> -> vector<32x128xf32>
    %20 = arith.addf %16, %19 : vector<32x128xf32>
    %c0_11 = arith.constant 0 : index
    %c0_12 = arith.constant 0 : index
    %21 = vector.load %arg27[%c0_11, %c0_12] : memref<32x128xf32, #tpu.memory_space<vmem>>, vector<32x128xf32>
    %22 = arith.truncf %21 : vector<32x128xf32> to vector<32x128xbf16>
    %c0_13 = arith.constant 0 : index
    %c0_14 = arith.constant 0 : index
    %c0_15 = arith.constant 0 : index
    %23 = vector.load %arg16[%c0_13, %c0_14, %c0_15] : memref<1x128x128xbf16, #tpu.memory_space<vmem>>, vector<1x128x128xbf16>
    %24 = vector.shape_cast %23 : vector<1x128x128xbf16> to vector<128x128xbf16>
    %cst_16 = arith.constant dense<0.000000e+00> : vector<32x128xf32>
    %25 = tpu.matmul %22, %24, %cst_16 {dimension_numbers = #tpu.dot_dimension_numbers<[1], [0], [0], [1], [0, 0, 1, 1], [], []>} : vector<32x128xbf16>, vector<128x128xbf16>, vector<32x128xf32> -> vector<32x128xf32>
    %26 = arith.addf %20, %25 : vector<32x128xf32>
    %c0_17 = arith.constant 0 : index
    %c0_18 = arith.constant 0 : index
    %c0_19 = arith.constant 0 : index
    %27 = vector.load %arg17[%c0_17, %c0_18, %c0_19] : memref<1x1x128xf32, #tpu.memory_space<vmem>>, vector<1x1x128xf32>
    %28 = vector.shape_cast %27 : vector<1x1x128xf32> to vector<1x128xf32>
    %29 = vector.broadcast %28 : vector<1x128xf32> to vector<32x128xf32>
    %30 = arith.addf %26, %29 : vector<32x128xf32>
    %31 = arith.negf %30 : vector<32x128xf32>
    %32 = math.exp %31 : vector<32x128xf32>
    %cst_20 = arith.constant 1.000000e+00 : f32
    %33 = vector.broadcast %cst_20 : f32 to vector<32x128xf32>
    %34 = arith.addf %33, %32 : vector<32x128xf32>
    %35 = arith.divf %33, %34 : vector<32x128xf32>
    %36 = arith.mulf %30, %35 : vector<32x128xf32>
    %37 = arith.truncf %36 : vector<32x128xf32> to vector<32x128xbf16>
    %c0_21 = arith.constant 0 : index
    %c0_22 = arith.constant 0 : index
    %c0_23 = arith.constant 0 : index
    %38 = vector.load %arg18[%c0_21, %c0_22, %c0_23] : memref<1x128x128xbf16, #tpu.memory_space<vmem>>, vector<1x128x128xbf16>
    %39 = vector.shape_cast %38 : vector<1x128x128xbf16> to vector<128x128xbf16>
    %cst_24 = arith.constant dense<0.000000e+00> : vector<32x128xf32>
    %40 = tpu.matmul %37, %39, %cst_24 {dimension_numbers = #tpu.dot_dimension_numbers<[1], [0], [0], [1], [0, 0, 1, 1], [], []>} : vector<32x128xbf16>, vector<128x128xbf16>, vector<32x128xf32> -> vector<32x128xf32>
    %c0_25 = arith.constant 0 : index
    %c0_26 = arith.constant 0 : index
    %c0_27 = arith.constant 0 : index
    %41 = vector.load %arg19[%c0_25, %c0_26, %c0_27] : memref<1x1x128xf32, #tpu.memory_space<vmem>>, vector<1x1x128xf32>
    %42 = vector.shape_cast %41 : vector<1x1x128xf32> to vector<1x128xf32>
    %43 = vector.broadcast %42 : vector<1x128xf32> to vector<32x128xf32>
    %44 = arith.addf %40, %43 : vector<32x128xf32>
    %45 = arith.negf %44 : vector<32x128xf32>
    %46 = math.exp %45 : vector<32x128xf32>
    %cst_28 = arith.constant 1.000000e+00 : f32
    %47 = vector.broadcast %cst_28 : f32 to vector<32x128xf32>
    %48 = arith.addf %47, %46 : vector<32x128xf32>
    %49 = arith.divf %47, %48 : vector<32x128xf32>
    %50 = arith.mulf %44, %49 : vector<32x128xf32>
    %c0_29 = arith.constant 0 : index
    %c0_30 = arith.constant 0 : index
    %51 = vector.load %arg27[%c0_29, %c0_30] : memref<32x128xf32, #tpu.memory_space<vmem>>, vector<32x128xf32>
    %52 = vector.broadcast %4 : vector<32x1xf32> to vector<32x128xf32>
    %53 = arith.mulf %50, %52 : vector<32x128xf32>
    %54 = arith.addf %51, %53 : vector<32x128xf32>
    %c0_31 = arith.constant 0 : index
    %c0_32 = arith.constant 0 : index
    %55 = vector.load %arg27[%c0_31, %c0_32] : memref<32x128xf32, #tpu.memory_space<vmem>>, vector<32x128xf32>
    tpu.vector_store %arg27[%c0_31, %c0_32], %54 {strides = array<i32>} : memref<32x128xf32, #tpu.memory_space<vmem>>, vector<32x128xf32>,
    %c0_33 = arith.constant 0 : index
    %c0_34 = arith.constant 0 : index
    %c0_35 = arith.constant 0 : index
    %56 = vector.load %arg20[%c0_33, %c0_34, %c0_35] : memref<1x1x128xf32, #tpu.memory_space<vmem>>, vector<1x1x128xf32>
    %57 = vector.shape_cast %56 : vector<1x1x128xf32> to vector<1x128xf32>
    %58 = vector.broadcast %57 : vector<1x128xf32> to vector<32x128xf32>
    %59 = arith.mulf %50, %58 : vector<32x128xf32>
    %cst_36 = arith.constant dense<0.000000e+00> : vector<32xf32>
    %60 = vector.multi_reduction <add>, %59, %cst_36 [1] : vector<32x128xf32> to vector<32xf32>
    %61 = vector.shape_cast %60 : vector<32xf32> to vector<32x1xf32>
    %62 = arith.index_cast %arg0 : i32 to index
    %63 = memref.load %arg14[%62] : memref<4xf32, #tpu.memory_space<smem>>
    %64 = vector.broadcast %63 : f32 to vector<32x1xf32>
    %65 = arith.addf %61, %64 : vector<32x1xf32>
    %66 = arith.negf %65 : vector<32x1xf32>
    %67 = math.exp %66 : vector<32x1xf32>
    %cst_37 = arith.constant 1.000000e+00 : f32
    %68 = vector.broadcast %cst_37 : f32 to vector<32x1xf32>
    %69 = arith.addf %68, %67 : vector<32x1xf32>
    %70 = arith.divf %68, %69 : vector<32x1xf32>
    %71 = vector.broadcast %70 : vector<32x1xf32> to vector<32x128xf32>
    %72 = arith.mulf %50, %71 : vector<32x128xf32>
    %c0_38 = arith.constant 0 : index
    %c0_39 = arith.constant 0 : index
    %73 = vector.load %arg5[%c0_38, %c0_39] : memref<16x32xbf16, #tpu.memory_space<vmem>>, vector<16x32xbf16>
    %74 = arith.truncf %72 : vector<32x128xf32> to vector<32x128xbf16>
    %cst_40 = arith.constant dense<0.000000e+00> : vector<16x128xf32>
    %75 = tpu.matmul %73, %74, %cst_40 {dimension_numbers = #tpu.dot_dimension_numbers<[1], [0], [0], [1], [0, 0, 1, 1], [], []>} : vector<16x32xbf16>, vector<32x128xbf16>, vector<16x128xf32> -> vector<16x128xf32>
    %c0_41 = arith.constant 0 : index
    %c0_42 = arith.constant 0 : index
    %76 = vector.load %arg26[%c0_41, %c0_42] : memref<16x128xf32, #tpu.memory_space<vmem>>, vector<16x128xf32>
    %77 = arith.addf %75, %76 : vector<16x128xf32>
    %78 = arith.truncf %77 : vector<16x128xf32> to vector<16x128xbf16>
    %c0_43 = arith.constant 0 : index
    %c0_44 = arith.constant 0 : index
    %c0_45 = arith.constant 0 : index
    %79 = vector.load %arg21[%c0_43, %c0_44, %c0_45] : memref<1x128x128xbf16, #tpu.memory_space<vmem>>, vector<1x128x128xbf16>
    %80 = vector.shape_cast %79 : vector<1x128x128xbf16> to vector<128x128xbf16>
    %cst_46 = arith.constant dense<0.000000e+00> : vector<16x128xf32>
    %81 = tpu.matmul %78, %80, %cst_46 {dimension_numbers = #tpu.dot_dimension_numbers<[1], [0], [0], [1], [0, 0, 1, 1], [], []>} : vector<16x128xbf16>, vector<128x128xbf16>, vector<16x128xf32> -> vector<16x128xf32>
    %c0_47 = arith.constant 0 : index
    %c0_48 = arith.constant 0 : index
    %c0_49 = arith.constant 0 : index
    %82 = vector.load %arg22[%c0_47, %c0_48, %c0_49] : memref<1x1x128xf32, #tpu.memory_space<vmem>>, vector<1x1x128xf32>
    %83 = vector.shape_cast %82 : vector<1x1x128xf32> to vector<1x128xf32>
    %84 = vector.broadcast %83 : vector<1x128xf32> to vector<16x128xf32>
    %85 = arith.addf %81, %84 : vector<16x128xf32>
    %86 = arith.negf %85 : vector<16x128xf32>
    %87 = math.exp %86 : vector<16x128xf32>
    %cst_50 = arith.constant 1.000000e+00 : f32
    %88 = vector.broadcast %cst_50 : f32 to vector<16x128xf32>
    %89 = arith.addf %88, %87 : vector<16x128xf32>
    %90 = arith.divf %88, %89 : vector<16x128xf32>
    %91 = arith.mulf %85, %90 : vector<16x128xf32>
    %92 = arith.truncf %91 : vector<16x128xf32> to vector<16x128xbf16>
    %c0_51 = arith.constant 0 : index
    %c0_52 = arith.constant 0 : index
    %c0_53 = arith.constant 0 : index
    %93 = vector.load %arg23[%c0_51, %c0_52, %c0_53] : memref<1x128x128xbf16, #tpu.memory_space<vmem>>, vector<1x128x128xbf16>
    %94 = vector.shape_cast %93 : vector<1x128x128xbf16> to vector<128x128xbf16>
    %cst_54 = arith.constant dense<0.000000e+00> : vector<16x128xf32>
    %95 = tpu.matmul %92, %94, %cst_54 {dimension_numbers = #tpu.dot_dimension_numbers<[1], [0], [0], [1], [0, 0, 1, 1], [], []>} : vector<16x128xbf16>, vector<128x128xbf16>, vector<16x128xf32> -> vector<16x128xf32>
    %c0_55 = arith.constant 0 : index
    %c0_56 = arith.constant 0 : index
    %c0_57 = arith.constant 0 : index
    %96 = vector.load %arg24[%c0_55, %c0_56, %c0_57] : memref<1x1x128xf32, #tpu.memory_space<vmem>>, vector<1x1x128xf32>
    %97 = vector.shape_cast %96 : vector<1x1x128xf32> to vector<1x128xf32>
    %98 = vector.broadcast %97 : vector<1x128xf32> to vector<16x128xf32>
    %99 = arith.addf %95, %98 : vector<16x128xf32>
    %c0_58 = arith.constant 0 : index
    %c0_59 = arith.constant 0 : index
    %100 = vector.load %arg26[%c0_58, %c0_59] : memref<16x128xf32, #tpu.memory_space<vmem>>, vector<16x128xf32>
    %101 = arith.addf %99, %100 : vector<16x128xf32>
    %c0_60 = arith.constant 0 : index
    %c0_61 = arith.constant 0 : index
    %102 = vector.load %arg26[%c0_60, %c0_61] : memref<16x128xf32, #tpu.memory_space<vmem>>, vector<16x128xf32>
    tpu.vector_store %arg26[%c0_60, %c0_61], %101 {strides = array<i32>} : memref<16x128xf32, #tpu.memory_space<vmem>>, vector<16x128xf32>,
    %c3_i32 = arith.constant 3 : i32
    %103 = arith.cmpi eq, %arg0, %c3_i32 : i32
    %104 = arith.extui %103 : i1 to i32
    %c0_i32_62 = arith.constant 0 : i32
    %105 = arith.cmpi ne, %104, %c0_i32_62 : i32
    scf.if %105 {
      %c0_63 = arith.constant 0 : index
      %c0_64 = arith.constant 0 : index
      %106 = vector.load %arg26[%c0_63, %c0_64] : memref<16x128xf32, #tpu.memory_space<vmem>>, vector<16x128xf32>
      %107 = arith.truncf %106 : vector<16x128xf32> to vector<16x128xbf16>
      %c0_65 = arith.constant 0 : index
      %c0_66 = arith.constant 0 : index
      %108 = vector.load %arg10[%c0_65, %c0_66] : memref<128x128xbf16, #tpu.memory_space<vmem>>, vector<128x128xbf16>
      %cst_67 = arith.constant dense<0.000000e+00> : vector<16x128xf32>
      %109 = tpu.matmul %107, %108, %cst_67 {dimension_numbers = #tpu.dot_dimension_numbers<[1], [0], [0], [1], [0, 0, 1, 1], [], []>} : vector<16x128xbf16>, vector<128x128xbf16>, vector<16x128xf32> -> vector<16x128xf32>
      %c0_68 = arith.constant 0 : index
      %c0_69 = arith.constant 0 : index
      %110 = vector.load %arg11[%c0_68, %c0_69] : memref<1x128xf32, #tpu.memory_space<vmem>>, vector<1x128xf32>
      %111 = vector.broadcast %110 : vector<1x128xf32> to vector<16x128xf32>
      %112 = arith.addf %109, %111 : vector<16x128xf32>
      %113 = arith.negf %112 : vector<16x128xf32>
      %114 = math.exp %113 : vector<16x128xf32>
      %cst_70 = arith.constant 1.000000e+00 : f32
      %115 = vector.broadcast %cst_70 : f32 to vector<16x128xf32>
      %116 = arith.addf %115, %114 : vector<16x128xf32>
      %117 = arith.divf %115, %116 : vector<16x128xf32>
      %118 = arith.mulf %112, %117 : vector<16x128xf32>
      %119 = arith.truncf %118 : vector<16x128xf32> to vector<16x128xbf16>
      %c0_71 = arith.constant 0 : index
      %c0_72 = arith.constant 0 : index
      %120 = vector.load %arg12[%c0_71, %c0_72] : memref<128x128xbf16, #tpu.memory_space<vmem>>, vector<128x128xbf16>
      %cst_73 = arith.constant dense<0.000000e+00> : vector<16x128xf32>
      %121 = tpu.matmul %119, %120, %cst_73 {dimension_numbers = #tpu.dot_dimension_numbers<[1], [0], [0], [1], [0, 0, 1, 1], [], []>} : vector<16x128xbf16>, vector<128x128xbf16>, vector<16x128xf32> -> vector<16x128xf32>
      %c0_74 = arith.constant 0 : index
      %c0_75 = arith.constant 0 : index
      %122 = vector.load %arg13[%c0_74, %c0_75] : memref<1x128xf32, #tpu.memory_space<vmem>>, vector<1x128xf32>
      %123 = vector.broadcast %122 : vector<1x128xf32> to vector<16x128xf32>
      %124 = arith.addf %121, %123 : vector<16x128xf32>
      %c0_76 = arith.constant 0 : index
      %c0_77 = arith.constant 0 : index
      %125 = vector.load %arg25[%c0_76, %c0_77] : memref<16x128xf32, #tpu.memory_space<vmem>>, vector<16x128xf32>
      tpu.vector_store %arg25[%c0_76, %c0_77], %124 {strides = array<i32>} : memref<16x128xf32, #tpu.memory_space<vmem>>, vector<16x128xf32>,
    } else {
    }
    return
  }
  func.func @transform_0(%arg0: i32) -> (i32, i32) {
    %c0_i32 = arith.constant 0 : i32
    %c0_i32_0 = arith.constant 0 : i32
    %c0_i32_1 = arith.constant 0 : i32
    return %c0_i32, %c0_i32_0 : i32, i32
  }
  func.func @transform_1(%arg0: i32) -> (i32, i32) {
    %c0_i32 = arith.constant 0 : i32
    %c0_i32_0 = arith.constant 0 : i32
    %c0_i32_1 = arith.constant 0 : i32
    return %c0_i32, %c0_i32_0 : i32, i32
  }
  func.func @transform_2(%arg0: i32) -> (i32, i32) {
    %c0_i32 = arith.constant 0 : i32
    %c0_i32_0 = arith.constant 0 : i32
    %c0_i32_1 = arith.constant 0 : i32
    return %c0_i32, %c0_i32_0 : i32, i32
  }
  func.func @transform_3(%arg0: i32) -> (i32, i32) {
    %c0_i32 = arith.constant 0 : i32
    %c0_i32_0 = arith.constant 0 : i32
    %c0_i32_1 = arith.constant 0 : i32
    return %c0_i32, %c0_i32_0 : i32, i32
  }
  func.func @transform_4(%arg0: i32) -> (i32, i32) {
    %c0_i32 = arith.constant 0 : i32
    %c0_i32_0 = arith.constant 0 : i32
    %c0_i32_1 = arith.constant 0 : i32
    return %c0_i32, %c0_i32_0 : i32, i32
  }
  func.func @transform_5(%arg0: i32) -> (i32, i32) {
    %c0_i32 = arith.constant 0 : i32
    %c0_i32_0 = arith.constant 0 : i32
    %c0_i32_1 = arith.constant 0 : i32
    return %c0_i32, %c0_i32_0 : i32, i32
  }
  func.func @transform_6(%arg0: i32) -> (i32, i32) {
    %c0_i32 = arith.constant 0 : i32
    %c0_i32_0 = arith.constant 0 : i32
    %c0_i32_1 = arith.constant 0 : i32
    return %c0_i32, %c0_i32_0 : i32, i32
  }
  func.func @transform_7(%arg0: i32) -> (i32, i32) {
    %c0_i32 = arith.constant 0 : i32
    %c0_i32_0 = arith.constant 0 : i32
    %c0_i32_1 = arith.constant 0 : i32
    return %c0_i32, %c0_i32_0 : i32, i32
  }
  func.func @transform_8(%arg0: i32) -> (i32, i32) {
    %c0_i32 = arith.constant 0 : i32
    %c0_i32_0 = arith.constant 0 : i32
    %c0_i32_1 = arith.constant 0 : i32
    return %c0_i32, %c0_i32_0 : i32, i32
  }
  func.func @transform_9(%arg0: i32) -> (i32, i32) {
    %c0_i32 = arith.constant 0 : i32
    %c0_i32_0 = arith.constant 0 : i32
    %c0_i32_1 = arith.constant 0 : i32
    return %c0_i32, %c0_i32_0 : i32, i32
  }
  func.func @transform_10(%arg0: i32) -> (i32, i32) {
    %c0_i32 = arith.constant 0 : i32
    %c0_i32_0 = arith.constant 0 : i32
    %c0_i32_1 = arith.constant 0 : i32
    return %c0_i32, %c0_i32_0 : i32, i32
  }
  func.func @transform_11(%arg0: i32) -> (i32, i32) {
    %c0_i32 = arith.constant 0 : i32
    %c0_i32_0 = arith.constant 0 : i32
    %c0_i32_1 = arith.constant 0 : i32
    return %c0_i32, %c0_i32_0 : i32, i32
  }
  func.func @transform_12(%arg0: i32) -> (i32, i32) {
    %c0_i32 = arith.constant 0 : i32
    %c0_i32_0 = arith.constant 0 : i32
    %c0_i32_1 = arith.constant 0 : i32
    return %c0_i32, %c0_i32_0 : i32, i32
  }
  func.func @transform_13(%arg0: i32) -> i32 {
    %c0_i32 = arith.constant 0 : i32
    %c0_i32_0 = arith.constant 0 : i32
    return %c0_i32 : i32
  }
  func.func @transform_14(%arg0: i32) -> (i32, i32, i32) {
    %c0_i32 = arith.constant 0 : i32
    %c0_i32_0 = arith.constant 0 : i32
    %c0_i32_1 = arith.constant 0 : i32
    return %arg0, %c0_i32, %c0_i32_0 : i32, i32, i32
  }
  func.func @transform_15(%arg0: i32) -> (i32, i32, i32) {
    %c0_i32 = arith.constant 0 : i32
    %c0_i32_0 = arith.constant 0 : i32
    %c0_i32_1 = arith.constant 0 : i32
    return %arg0, %c0_i32, %c0_i32_0 : i32, i32, i32
  }
  func.func @transform_16(%arg0: i32) -> (i32, i32, i32) {
    %c0_i32 = arith.constant 0 : i32
    %c0_i32_0 = arith.constant 0 : i32
    %c0_i32_1 = arith.constant 0 : i32
    return %arg0, %c0_i32, %c0_i32_0 : i32, i32, i32
  }
  func.func @transform_17(%arg0: i32) -> (i32, i32, i32) {
    %c0_i32 = arith.constant 0 : i32
    %c0_i32_0 = arith.constant 0 : i32
    %c0_i32_1 = arith.constant 0 : i32
    return %arg0, %c0_i32, %c0_i32_0 : i32, i32, i32
  }
  func.func @transform_18(%arg0: i32) -> (i32, i32, i32) {
    %c0_i32 = arith.constant 0 : i32
    %c0_i32_0 = arith.constant 0 : i32
    %c0_i32_1 = arith.constant 0 : i32
    return %arg0, %c0_i32, %c0_i32_0 : i32, i32, i32
  }
  func.func @transform_19(%arg0: i32) -> (i32, i32, i32) {
    %c0_i32 = arith.constant 0 : i32
    %c0_i32_0 = arith.constant 0 : i32
    %c0_i32_1 = arith.constant 0 : i32
    return %arg0, %c0_i32, %c0_i32_0 : i32, i32, i32
  }
  func.func @transform_20(%arg0: i32) -> (i32, i32, i32) {
    %c0_i32 = arith.constant 0 : i32
    %c0_i32_0 = arith.constant 0 : i32
    %c0_i32_1 = arith.constant 0 : i32
    return %arg0, %c0_i32, %c0_i32_0 : i32, i32, i32
  }
  func.func @transform_21(%arg0: i32) -> (i32, i32, i32) {
    %c0_i32 = arith.constant 0 : i32
    %c0_i32_0 = arith.constant 0 : i32
    %c0_i32_1 = arith.constant 0 : i32
    return %arg0, %c0_i32, %c0_i32_0 : i32, i32, i32
  }
  func.func @transform_22(%arg0: i32) -> (i32, i32, i32) {
    %c0_i32 = arith.constant 0 : i32
    %c0_i32_0 = arith.constant 0 : i32
    %c0_i32_1 = arith.constant 0 : i32
    return %arg0, %c0_i32, %c0_i32_0 : i32, i32, i32
  }
  func.func @transform_23(%arg0: i32) -> (i32, i32, i32) {
    %c0_i32 = arith.constant 0 : i32
    %c0_i32_0 = arith.constant 0 : i32
    %c0_i32_1 = arith.constant 0 : i32
    return %arg0, %c0_i32, %c0_i32_0 : i32, i32, i32
  }
  func.func @transform_24(%arg0: i32) -> (i32, i32) {
    %c0_i32 = arith.constant 0 : i32
    %c0_i32_0 = arith.constant 0 : i32
    %c0_i32_1 = arith.constant 0 : i32
    return %c0_i32, %c0_i32_0 : i32, i32
  }
}

</mosaic_0001>

<bundles_post_ra>
// kernel: tpu_custom_call.1
= control target key start
LH: loop header
LB: loop body
LE: loop exit
PB: predicated region body
PF: predicated region fallthrough
CT: control target
= control target key end

     0   :  { %s4961_s0 = inlined_call_operand.vmem [shape: f32[16,128], index: 0, kind: input, shape index: {}]   ;;  %s4962_s1 = inlined_call_operand.vmem [shape: f32[32,1], index: 1, kind: input, shape index: {}]   ;;  %s4963_s2 = inlined_call_operand.vmem [shape: bf16[32,16], index: 2, kind: input, shape index: {}]   ;;  %s4964_s3 = inlined_call_operand.vmem [shape: bf16[32,16], index: 3, kind: input, shape index: {}]   ;;  %s4965_s4 = inlined_call_operand.hbm [shape: bf16[16,32], index: 4, kind: input, shape index: {}]   ;;  %s4966_s5 = inlined_call_operand.vmem [shape: bf16[128,128], index: 5, kind: input, shape index: {}]   ;;  %s4967_s6 = inlined_call_operand.hbm [shape: f32[1,128], index: 6, kind: input, shape index: {}]   ;;  %s4968_s7 = inlined_call_operand.hbm [shape: f32[1,128], index: 7, kind: input, shape index: {}]   ;;  %s4969_s8 = inlined_call_operand.hbm [shape: f32[1,128], index: 8, kind: input, shape index: {}]   ;;  %s4970_s9 = inlined_call_operand.hbm [shape: bf16[128,128], index: 9, kind: input, shape index: {}]   ;;  %s4971_s10 = inlined_call_operand.hbm [shape: f32[1,128], index: 10, kind: input, shape index: {}]   ;;  %s4972_s11 = inlined_call_operand.hbm [shape: bf16[128,128], index: 11, kind: input, shape index: {}]   ;;  %s4973_s12 = inlined_call_operand.hbm [shape: f32[1,128], index: 12, kind: input, shape index: {}]   ;;  %s4974_s13 = inlined_call_operand.hbm [shape: f32[4], index: 13, kind: input, shape index: {}]   ;;  %s4975_s14 = inlined_call_operand.hbm [shape: bf16[4,128,256], index: 14, kind: input, shape index: {}]   ;;  %s4976_s15 = inlined_call_operand.hbm [shape: bf16[4,128,128], index: 15, kind: input, shape index: {}]   ;;  %s4977_s16 = inlined_call_operand.vmem [shape: f32[4,1,128], index: 16, kind: input, shape index: {}]   ;;  %s4978_s17 = inlined_call_operand.hbm [shape: bf16[4,128,128], index: 17, kind: input, shape index: {}]   ;;  %s4979_s18 = inlined_call_operand.vmem [shape: f32[4,1,128], index: 18, kind: input, shape index: {}]   ;;  %s4980_s19 = inlined_call_operand.vmem [shape: f32[4,1,128], index: 19, kind: input, shape index: {}]   ;;  %s4981_s20 = inlined_call_operand.hbm [shape: bf16[4,128,128], index: 20, kind: input, shape index: {}]   ;;  %s4982_s21 = inlined_call_operand.vmem [shape: f32[4,1,128], index: 21, kind: input, shape index: {}]   ;;  %s4983_s22 = inlined_call_operand.hbm [shape: bf16[4,128,128], index: 22, kind: input, shape index: {}]   ;;  %s4984_s23 = inlined_call_operand.vmem [shape: f32[4,1,128], index: 23, kind: input, shape index: {}]   ;;  %s4985_s24 = inlined_call_operand.hbm [shape: f32[16,128], index: 24, kind: output, shape index: {}]  }
   0x1   :  { %5004 = sst [smem:[#allocation40_spill]] %s4961_s0 }
   0x2   :  { %5005 = sst [smem:[#allocation41_spill]] %s4962_s1 }
   0x3   :  { %5006 = sst [smem:[#allocation42_spill]] %s4963_s2 }
   0x4   :  { %5007 = sst [smem:[#allocation43_spill]] %s4964_s3 }
   0x5   :  { %5008 = sst [smem:[#allocation44_spill]] %s4965_s4 }
   0x6   :  { %5009 = sst [smem:[#allocation45_spill]] %s4966_s5 }
   0x7   :  { %5010 = sst [smem:[#allocation46_spill]] %s4967_s6 }
   0x8   :  { %5011 = sst [smem:[#allocation47_spill]] %s4968_s7 }
   0x9   :  { %5012 = sst [smem:[#allocation48_spill]] %s4969_s8 }
   0xa   :  { %5013 = sst [smem:[#allocation49_spill]] %s4970_s9 }
   0xb   :  { %5014 = sst [smem:[#allocation50_spill]] %s4971_s10 }
   0xc   :  { %5015 = sst [smem:[#allocation51_spill]] %s4972_s11 }
   0xd   :  { %5016 = sst [smem:[#allocation52_spill]] %s4973_s12 }
   0xe   :  { %5017 = sst [smem:[#allocation53_spill]] %s4975_s14 }
   0xf   :  { %5018 = sst [smem:[#allocation54_spill]] %s4976_s15 }
  0x10   :  { %5019 = sst [smem:[#allocation55_spill]] %s4977_s16 }
  0x11   :  { %5020 = sst [smem:[#allocation56_spill]] %s4979_s18 }
  0x12   :  { %5021 = sst [smem:[#allocation57_spill]] %s4980_s19 }
  0x13   :  { %5022 = sst [smem:[#allocation58_spill]] %s4982_s21 }
  0x14   :  { %5023 = sst [smem:[#allocation59_spill]] %s4984_s23 }
  0x15   :  { %5024 = sst [smem:[#allocation60_spill]] %s4985_s24 }
  0x16   :  { %29 = vsyncpa [#allocation5], 0 }
  0x17   :  { %30 = vsyncpa [#allocation9], 0 }
  0x18   :  { %31 = vsyncpa [#allocation12], 0 }
  0x19   :  { %32 = vsyncpa [#allocation15], 0 }
  0x1a   :  { %33 = vsyncpa [#allocation18], 0 }
  0x1b   :  { %34 = vsyncpa [#allocation7], 0 }
  0x1c   :  { %35 = vsyncpa [#allocation6], 0  ;;  %s4313_s5 = smov 0   ;;  %s4315_s26 = smov 0  }
  0x1d   :  { %s4317_s27 = smov 0   ;;  %s4319_s28 = smov 0  }
  0x1e LB: > { %5025 = sst [smem:[#allocation34_spill]] %s4160_s26  ;;  %s4335_s7 = sadd.s32 4294967295, %s4168_s28   ;;  %s4168_s28 = sphi %s4319_s28, %s5079_s28   ;;  %s4164_s27 = sphi %s4317_s27, %s5082_s27   ;;  %s4160_s26 = sphi %s4315_s26, %s5081_s26   ;;  %s4156_s5 = sphi %s4313_s5, %s5080_s5  }
  0x1f   : > { %5026 = sst [smem:[#allocation35_spill]] %s4164_s27  ;;  %p2913_p0 = scmp.ge.s32.totalorder %s4168_s28, 1 }
  0x20   : > { %s5027_s29 = sld [smem:[#allocation44_spill]]  ;;  %p356_p1 = scmp.eq.s32.totalorder %s4335_s7, 0 }
  0x21   : > { %5028 = sst [smem:[#allocation36_spill]] %s4335_s7  ;;  %p621_p2 = scmp.lt.s32.totalorder %s4168_s28, 5 }
  0x22   : > { %p2914_p3 = scmp.ne.s32.totalorder %s4335_s7, 0  ;;  %s4170_s3 = smov [#allocation4]  }
  0x23   : > { %p4341_p4 = pnand %p2913_p0, %p621_p2  ;;  %s646_s25 = sshll.u32 %s4170_s3, 4  ;;  %s647_s25 = int_to_ptr.vmem [resolvable:$true] %s646_s25 }
  0x24   : > { %s4991_s4 = smov 64   ;;  %s4993_s1 = smov 4  }
  0x25   : > { %p3434_p5 = pneg %p4341_p4  ;;  %s4359_s6 = sadd.s32 1, %s4168_s28  }
  0x26   : > { %s644_s0 = sshll.u32 %s5027_s29, 4  ;;  %5031 = sst [smem:[#allocation37_spill]] %s4359_s6  ;;  %s645_s0 = int_to_ptr.hbm [resolvable:$true] %s644_s0 }
  0x27   : > { %p4349_p6 = pnand %p3434_p5, %p356_p1  ;;  %s339_s2 = ssub.s32 %s4168_s28, %s4359_s6 }
  0x28   : > { %s342_s29 = sadd.s32 1, %s4164_s27  ;;  %p340_p7 = scmp.eq.s32.totalorder %s339_s2, 0 }
  0x29   : > { %3437 = dma.hbm_to_vmem [thread:$0]  (!%p4349_p6), %s645_s0, 128, %s647_s25, [#allocation5], %s4991_s4, %s4991_s4, %s4993_s1  }
  0x2a   : > { %p349_p8 = scmp.ne.s32.totalorder %s4164_s27, %s4160_s26  ;;  %p350_p9 = scmp.eq.s32.totalorder %s4168_s28, 0 }
  0x2b   : > { %p355_p10 = scmp.ne.s32.totalorder %s4160_s26, %s4156_s5  ;;  %p3487_p13 = scmp.lt.s32.totalorder %s4168_s28, 4 }
  0x2c   : > { %s4369_s3 = scalar_select %p340_p7, %s4164_s27, %s342_s29  }
  0x2d   : > { %p4371_p11 = por %p350_p9, %p349_p8  ;;  %p4377_p12 = por %p356_p1, %p355_p10 }
  0x2e   : > { %5032 = sst [smem:[#allocation38_spill]] %s4369_s3  ;;  %s761_s0 = sand.u32 1, %s4168_s28  }
  0x2f   : > { %s5034_s23 = scalar_select %p4377_p12, 1, 0 }
  0x30   : > { %s763_s25 = sand.u32 1, %s4164_s27   ;;  %s3302_s2 = sshll.u32 %s4168_s28, 7 }
  0x31   : > { %5035 = sst [smem:[#allocation39_spill]] %s5034_s23  ;;  %s2924_s4 = sshll.u32 %s763_s25, 7 }
  0x32   : > { %s5036_s14 = sld [smem:[#allocation53_spill]]  ;;  %s765_s3 = scalar_lea.vmem [#allocation20], %s2924_s4 }
  0x33   : > { %s773_s21 = sshll.u32 %s765_s3, 4  ;;  %p4390_p0 = pnand %p3487_p13, %p4371_p11  ;;  %s774_s21 = int_to_ptr.vmem [resolvable:$true] %s773_s21 }
  0x34   : > { %s4394_s18 = sshll.u32 %s763_s25, 6  ;;  %s4396_s27 = scalar_lea.sflag [#allocation5], %s761_s0 }
  0x35   : > { %p4400_p5 = pneg %p4390_p0 }
  0x38   : > { %s770_s5 = scalar_lea.hbm %s5036_s14, %s3302_s2  ;;  %s3710_s6 = scalar_lea.hbm %s5036_s14, 512 }
  0x39   : > { %s771_s29 = sshll.u32 %s770_s5, 4  ;;  %s772_s29 = int_to_ptr.hbm [resolvable:$true] %s771_s29 }
  0x3a   : > { %s3703_s16 = sshra.s32 %s772_s29, 4  ;;  %s3704_s16 = int_to_ptr.hbm [resolvable:$true] %s3703_s16 }
  0x3b   : > { %s3705_s23 = scalar_lea.hbm %s3704_s16, 128  ;;  %p3711_p9 = scmp.lt.s32.totalorder %s3704_s16, %s5036_s14 }
  0x3c   : > { %p3706_p2 = scmp.ne.s32.totalorder %s3704_s16, %s3705_s23  ;;  %p3712_p10 = scmp.lt.s32.totalorder %s3710_s6, %s3705_s23 }
  0x3e   : > { %p3708_p7 = pnand %p4400_p5, %p3706_p2  ;;  %p3713_p11 = por %p3712_p10, %p3711_p9 }
  0x40   : > { %p3709_p8 = pneg %p3708_p7 }
  0x42   : > { %p3714_p13 = pnand %p3713_p11, %p3709_p8 }
  0x44   : > { %3717 = shalt.err (!%p3714_p13)
}
  0x45   : > { %s4173_s25 = smov 128   ;;  %s4174_s2 = smov 8  }
  0x46   : > { %3465 = dma.hbm_to_vmem [thread:$0]  (!%p4390_p0), %s772_s29, 2048, %s774_s21, %s4396_s27, %s4173_s25, %s4173_s25, %s4174_s2  }
  0x47   : > { %s4416_s5 = sshll.u32 %s4168_s28, 6  ;;  %s787_s24 = scalar_lea.vmem [#allocation21], %s4394_s18 }
  0x48   : > { %s795_s1 = sshll.u32 %s787_s24, 4  ;;  %s5039_s15 = sld [smem:[#allocation54_spill]]  ;;  %s796_s1 = int_to_ptr.vmem [resolvable:$true] %s795_s1 }
  0x49   : > { %s820_s26 = scalar_lea.hbm %s4978_s17, %s4416_s5 }
  0x4e   : > { %s792_s6 = scalar_lea.hbm %s5039_s15, %s4416_s5  ;;  %s3740_s25 = scalar_lea.hbm %s5039_s15, 256 }
  0x4f   : > { %s793_s3 = sshll.u32 %s792_s6, 4  ;;  %s794_s3 = int_to_ptr.hbm [resolvable:$true] %s793_s3 }
  0x50   : > { %s3733_s7 = sshra.s32 %s794_s3, 4  ;;  %s3734_s7 = int_to_ptr.hbm [resolvable:$true] %s3733_s7 }
  0x51   : > { %s3735_s21 = scalar_lea.hbm %s3734_s7, 64  ;;  %p3741_p9 = scmp.lt.s32.totalorder %s3734_s7, %s5039_s15 }
  0x52   : > { %p3736_p2 = scmp.ne.s32.totalorder %s3734_s7, %s3735_s21  ;;  %p3742_p10 = scmp.lt.s32.totalorder %s3740_s25, %s3735_s21 }
  0x54   : > { %p3738_p7 = pnand %p3736_p2, %p4400_p5  ;;  %p3743_p11 = por %p3742_p10, %p3741_p9 }
  0x56   : > { %p3739_p8 = pneg %p3738_p7 }
  0x58   : > { %p3744_p13 = pnand %p3743_p11, %p3739_p8 }
  0x5a   : > { %3747 = shalt.err (!%p3744_p13)
}
  0x5b   : > { %s5040_s14 = smov 4   ;;  %s5041_s16 = smov 64  }
  0x5c   : > { %3468 = dma.hbm_to_vmem [thread:$0]  (!%p4390_p0), %s794_s3, 1024, %s796_s1, %s4396_s27, %s5041_s16, %s5041_s16, %s5040_s14  }
  0x5d   : > { %s821_s23 = sshll.u32 %s820_s26, 4  ;;  %s815_s6 = scalar_lea.vmem [#allocation22], %s4394_s18  ;;  %s822_s23 = int_to_ptr.hbm [resolvable:$true] %s821_s23 }
  0x5e   : > { %s823_s0 = sshll.u32 %s815_s6, 4  ;;  %s3763_s28 = sshra.s32 %s822_s23, 4  ;;  %s824_s0 = int_to_ptr.vmem [resolvable:$true] %s823_s0  ;;  %s3764_s28 = int_to_ptr.hbm [resolvable:$true] %s3763_s28 }
  0x5f   : > { %s3765_s7 = scalar_lea.hbm %s3764_s28, 64  ;;  %s3770_s25 = scalar_lea.hbm %s4978_s17, 256 }
  0x60   : > { %p3766_p2 = scmp.ne.s32.totalorder %s3764_s28, %s3765_s7  ;;  %p3771_p9 = scmp.lt.s32.totalorder %s3764_s28, %s4978_s17 }
  0x61   : > { %p3772_p10 = scmp.lt.s32.totalorder %s3770_s25, %s3765_s7 }
  0x62   : > { %p3768_p7 = pnand %p3766_p2, %p4400_p5 }
  0x63   : > { %p3773_p11 = por %p3772_p10, %p3771_p9 }
  0x64   : > { %p3769_p8 = pneg %p3768_p7 }
  0x66   : > { %p3774_p13 = pnand %p3773_p11, %p3769_p8 }
  0x68   : > { %3777 = shalt.err (!%p3774_p13)
}
  0x69   : > { %3471 = dma.hbm_to_vmem [thread:$0]  (!%p4390_p0), %s822_s23, 1024, %s824_s0, %s4396_s27, %s5041_s16, %s5041_s16, %s5040_s14  }
  0x6a   : > { %s5042_s3 = sld [smem:[#allocation46_spill]]  ;;  %s4175_s28 = smov [#allocation8]  }
  0x6b   : > { %s664_s7 = sshll.u32 %s4175_s28, 4  ;;  %s5043_s25 = sld [smem:[#allocation48_spill]]  ;;  %s665_s7 = int_to_ptr.vmem [resolvable:$true] %s664_s7 }
  0x6c   : > { %s4176_s24 = smov [#allocation11]   ;;  %s5044_s10 = sld [smem:[#allocation50_spill]] }
  0x6d   : > { %s688_s23 = sshll.u32 %s4176_s24, 4  ;;  %s4177_s1 = smov [#allocation14]   ;;  %s689_s23 = int_to_ptr.vmem [resolvable:$true] %s688_s23 }
  0x6e   : > { %s854_s29 = scalar_lea.hbm %s4981_s20, %s4416_s5  ;;  %s5045_s0 = sld [smem:[#allocation47_spill]] }
  0x6f   : > { %s3890_s21 = scalar_lea.hbm %s4981_s20, 256 }
  0x70   : > { %s662_s6 = sshll.u32 %s5042_s3, 4  ;;  %s714_s3 = sshll.u32 %s4177_s1, 4  ;;  %s663_s6 = int_to_ptr.hbm [resolvable:$true] %s662_s6  ;;  %s715_s3 = int_to_ptr.vmem [resolvable:$true] %s714_s3 }
  0x71   : > { %s686_s2 = sshll.u32 %s5043_s25, 4  ;;  %s687_s2 = int_to_ptr.hbm [resolvable:$true] %s686_s2 }
  0x72   : > { %3440 = dma.hbm_to_vmem [thread:$0]  (!%p4349_p6), %s663_s6, 16, %s665_s7, [#allocation9]  }
  0x73   : > { %s712_s26 = sshll.u32 %s5044_s10, 4  ;;  %s855_s6 = sshll.u32 %s854_s29, 4  ;;  %s713_s26 = int_to_ptr.hbm [resolvable:$true] %s712_s26  ;;  %s856_s6 = int_to_ptr.hbm [resolvable:$true] %s855_s6 }
  0x74   : > { %3446 = dma.hbm_to_vmem [thread:$0]  (!%p4349_p6), %s687_s2, 16, %s689_s23, [#allocation12]  }
  0x75   : > { %3452 = dma.hbm_to_vmem [thread:$0]  (!%p4349_p6), %s713_s26, 16, %s715_s3, [#allocation15]  }
  0x76   : > { %s849_s7 = scalar_lea.vmem [#allocation23], %s4394_s18  ;;  %s674_s10 = sshll.u32 %s5045_s0, 4  ;;  %s675_s10 = int_to_ptr.hbm [resolvable:$true] %s674_s10 }
  0x77   : > { %s857_s25 = sshll.u32 %s849_s7, 4  ;;  %s3883_s2 = sshra.s32 %s856_s6, 4  ;;  %s858_s25 = int_to_ptr.vmem [resolvable:$true] %s857_s25  ;;  %s3884_s2 = int_to_ptr.hbm [resolvable:$true] %s3883_s2 }
  0x78   : > { %s3885_s23 = scalar_lea.hbm %s3884_s2, 64  ;;  %p3891_p9 = scmp.lt.s32.totalorder %s3884_s2, %s4981_s20 }
  0x79   : > { %p3886_p2 = scmp.ne.s32.totalorder %s3884_s2, %s3885_s23  ;;  %p3892_p10 = scmp.lt.s32.totalorder %s3890_s21, %s3885_s23 }
  0x7b   : > { %p3888_p7 = pnand %p3886_p2, %p4400_p5  ;;  %p3893_p11 = por %p3892_p10, %p3891_p9 }
  0x7d   : > { %p3889_p8 = pneg %p3888_p7 }
  0x7f   : > { %p3894_p13 = pnand %p3893_p11, %p3889_p8 }
  0x81   : > { %3897 = shalt.err (!%p3894_p13)
}
  0x82   : > { %3474 = dma.hbm_to_vmem [thread:$0]  (!%p4390_p0), %s856_s6, 1024, %s858_s25, %s4396_s27, %s5041_s16, %s5041_s16, %s5040_s14  }
  0x83   : > { %s4178_s29 = smov [#allocation10]   ;;  %s5046_s9 = sld [smem:[#allocation49_spill]] }
  0x84   : > { %s676_s7 = sshll.u32 %s4178_s29, 4  ;;  %s5047_s11 = sld [smem:[#allocation51_spill]]  ;;  %s677_s7 = int_to_ptr.vmem [resolvable:$true] %s676_s7 }
  0x85   : > { %3443 = dma.hbm_to_vmem [thread:$0]  (!%p4349_p6), %s675_s10, 16, %s677_s7, [#allocation9]  }
  0x86   : > { %s4179_s28 = smov [#allocation13]   ;;  %s4180_s6 = smov [#allocation16]  }
  0x87   : > { %s699_s21 = sshll.u32 %s4179_s28, 4  ;;  %s725_s25 = sshll.u32 %s4180_s6, 4  ;;  %s700_s21 = int_to_ptr.vmem [resolvable:$true] %s699_s21  ;;  %s726_s25 = int_to_ptr.vmem [resolvable:$true] %s725_s25 }
  0x88   : > { %s5048_s12 = sld [smem:[#allocation52_spill]]  ;;  %s750_s15 = sshll.u32 %s4974_s13, 4  ;;  %s751_s15 = int_to_ptr.hbm [resolvable:$true] %s750_s15 }
  0x89   : > { %s697_s0 = sshll.u32 %s5046_s9, 4  ;;  %s4181_s24 = smov [#allocation17]   ;;  %s698_s0 = int_to_ptr.hbm [resolvable:$true] %s697_s0 }
  0x8a   : > { %s723_s1 = sshll.u32 %s5047_s11, 4  ;;  %s4182_s2 = smov [#allocation19]   ;;  %s724_s1 = int_to_ptr.hbm [resolvable:$true] %s723_s1 }
  0x8b   : > { %3449 = dma.hbm_to_vmem [thread:$0]  (!%p4349_p6), %s698_s0, 1024, %s700_s21, [#allocation12], %s5041_s16, %s5041_s16, %s5040_s14  }
  0x8c   : > { %3455 = dma.hbm_to_vmem [thread:$0]  (!%p4349_p6), %s724_s1, 1024, %s726_s25, [#allocation15], %s5041_s16, %s5041_s16, %s5040_s14  }
  0x8d   : > { %s740_s0 = sshll.u32 %s4181_s24, 4  ;;  %s882_s21 = scalar_lea.hbm %s4983_s22, %s4416_s5  ;;  %s741_s0 = int_to_ptr.vmem [resolvable:$true] %s740_s0 }
  0x8e   : > { %s738_s3 = sshll.u32 %s5048_s12, 4  ;;  %s883_s6 = sshll.u32 %s882_s21, 4  ;;  %s739_s3 = int_to_ptr.hbm [resolvable:$true] %s738_s3  ;;  %s884_s6 = int_to_ptr.hbm [resolvable:$true] %s883_s6 }
  0x8f   : > { %3458 = dma.hbm_to_vmem [thread:$0]  (!%p4349_p6), %s739_s3, 16, %s741_s0, [#allocation18]  }
  0x90   : > { %3461 = dma.hbm_to_smem (!%p4349_p6), %s751_s15, 16, %s4182_s2, [#allocation7]  }
  0x91   : > { %s877_s1 = scalar_lea.vmem [#allocation24], %s4394_s18  ;;  %s4048_s10 = sshra.s32 %s884_s6, 4  ;;  %s4049_s10 = int_to_ptr.hbm [resolvable:$true] %s4048_s10 }
  0x92   : > { %s885_s25 = sshll.u32 %s877_s1, 4  ;;  %s4050_s26 = scalar_lea.hbm %s4049_s10, 64  ;;  %s886_s25 = int_to_ptr.vmem [resolvable:$true] %s885_s25 }
  0x93   : > { %p4051_p2 = scmp.ne.s32.totalorder %s4049_s10, %s4050_s26  ;;  %s4055_s8 = scalar_lea.hbm %s4983_s22, 256 }
  0x94   : > { %p4056_p6 = scmp.lt.s32.totalorder %s4049_s10, %s4983_s22  ;;  %p4057_p9 = scmp.lt.s32.totalorder %s4055_s8, %s4050_s26 }
  0x95   : > { %p4053_p7 = pnand %p4051_p2, %p4400_p5 }
  0x96   : > { %p4058_p10 = por %p4057_p9, %p4056_p6 }
  0x97   : > { %p4054_p8 = pneg %p4053_p7 }
  0x99   : > { %p4059_p11 = pnand %p4058_p10, %p4054_p8 }
  0x9b   : > { %4062 = shalt.err (!%p4059_p11)
}
  0x9c   : > { %3477 = dma.hbm_to_vmem [thread:$0]  (!%p4390_p0), %s884_s6, 1024, %s886_s25, %s4396_s27, %s5041_s16, %s5041_s16, %s5040_s14  }
  0x9d   : > { %903 = sbr.rel (%p4341_p4) target bundleno = 1962 (0x7aa), region = 116  ;;  %s5049_s18 = sld [smem:[#allocation36_spill]] (!%p4341_p4) }
  0xa2   : > { %4123 = dma.done.wait (%p356_p1), [#allocation5], 128  }
  0xa3   : > { %4125 = vsyncadd (%p356_p1), [#allocation5], 4294967168 }
  0xa4   : > { %4127 = dma.done.wait (%p356_p1), [#allocation9], 32  }
  0xa5   : > { %4129 = vsyncadd (%p356_p1), [#allocation9], 4294967264 }
  0xa6   : > { %4131 = dma.done.wait (%p356_p1), [#allocation12], 1040  }
  0xa7   : > { %4133 = vsyncadd (%p356_p1), [#allocation12], 4294966256 }
  0xa8   : > { %4135 = dma.done.wait (%p356_p1), [#allocation15], 1040  }
  0xa9   : > { %4137 = vsyncadd (%p356_p1), [#allocation15], 4294966256 }
  0xaa   : > { %4139 = dma.done.wait (%p356_p1), [#allocation18], 16  }
  0xab   : > { %4141 = vsyncadd (%p356_p1), [#allocation18], 4294967280 }
  0xac   : > { %4143 = dma.done.wait (%p356_p1), [#allocation7], 16  }
  0xad   : > { %4145 = vsyncadd (%p356_p1), [#allocation7], 4294967280  ;;  %s5050_s19 = sld [smem:[#allocation34_spill]]  ;;  %s950_s30 = sand.u32 1, %s5049_s18  }
  0xae   : > { %s951_s14 = scalar_lea.sflag [#allocation5], %s950_s30 }
  0xb3   : > { %s952_s4 = sand.u32 1, %s5050_s19  }
  0xb4   : > { %s2949_s5 = sshll.u32 %s952_s4, 7 }
  0xb5   : > { %s4568_s16 = scalar_lea.vmem [#allocation20], %s2949_s5 }
  0xb6   : > { %4147 = dma.done.wait (%p4377_p12), %s951_s14, 6144  }
  0xb7   : > { %4149 = vsyncadd (%p4377_p12), %s951_s14, 4294961152  ;;  %s2950_s24 = sshll.u32 %s952_s4, 6 }
  0xb8   : > { %s4574_s0 = scalar_lea.vmem [#allocation21], %s2950_s24  ;;  %s4576_s2 = scalar_lea.vmem [#allocation22], %s2950_s24 }
  0xb9   : > { %s4578_s23 = scalar_lea.vmem [#allocation23], %s2950_s24  ;;  %s4580_s28 = scalar_lea.vmem [#allocation24], %s2950_s24 }
  0xba   : > { %1000 = sfence }
  0xbb   : > { %p1091_p1 = scmp.lt.s32.totalorder %s5049_s18, 3  ;;  %v1107_v0 = vlaneseq  ;;  %s5052_s25 = sld [smem:[#allocation55_spill]]  ;;  %v4183_v3 = vmov 0.0  }
  0xbc   : > { %s5053_s29 = sld [smem:[#allocation56_spill]] }
  0xbd   : > { %s4584_s21 = scalar_select %p1091_p1, %s5049_s18, 3  ;;  %v1108_v1 = vshrl.u32 %v1107_v0, 7 }
  0xbe   : > { %s5054_s19 = sld [smem:[#allocation57_spill]] }
  0xbf   : > { %v1111_v2 = vadd.s32 24, %v1108_v1  ;;  %s5055_s5 = sld [smem:[#allocation58_spill]] }
  0xc0   : > { %s5056_s11 = sld [smem:[#allocation59_spill]] }
  0xc1   : > { %s1093_s10 = scalar_lea.vmem %s5052_s25, %s4584_s21  ;;  %vm1115_vm0 = vcmp.lt.s32.totalorder %v1111_v2, 30  ;;  %s5057_s25 = sld [smem:[#allocation41_spill]] (!%p2914_p3) }
  0xc2   : > { %s1096_s8 = scalar_lea.vmem %s5053_s29, %s4584_s21  ;;  %v4606_v4 = vsel %vm1115_vm0, 1.0, %v4183_v3  ;;  %1127 = sbr.rel (%p2914_p3) target bundleno = 430 (0x1ae), region = 176 }
  0xc3   : > { %s5058_s15 = sld [smem:[#allocation45_spill]] (!%p2914_p3) }
  0xc4   : > { %s1099_s27 = scalar_lea.vmem %s5054_s19, %s4584_s21 }
  0xc5   : > { %s1102_s14 = scalar_lea.vmem %s5055_s5, %s4584_s21  ;;  %s5059_s5 = sld [smem:[#allocation40_spill]] (!%p2914_p3) }
  0xc6   : > { %s1105_s12 = scalar_lea.vmem %s5056_s11, %s4584_s21 }
  0xc7   : > { %v1298_v5 = vld [vmem:[%s5057_s25 + $0x18] sm:$0xff]  ;;  %v1296_v6 = vld [vmem:[%s5057_s25 + $0x8] sm:$0xff]  ;;  %v4184_v8 = vmov 0   ;;  %v1297_v10 = vld [vmem:[%s5057_s25 + $0x10] sm:$0xff] }
  0xc8   : > { %3550 = vset.pattern.permute.xlu1 %v4184_v8  ;;  %3549 = vset.pattern.permute.xlu0 %v4184_v8  ;;  %v1295_v11 = vld [vmem:[%s5057_s25] sm:$0xff]  ;;  %v3551_v21 = vld [vmem:[#allocation10] ss:$0 sm:$0xff]  ;;  %v3552_v22 = vld [vmem:[#allocation11] ss:$0 sm:$0xff] }
  0xc9   : > { %v3314_v7 = vld [vmem:[%s5058_s15 + $0x38] sm:$0xff]  ;;  %1317 = vperm.xlu0 %3549, %v1298_v5   ;;  %1307 = vperm.xlu1 %3550, %v1296_v6   ;;  %v3313_v9 = vld [vmem:[%s5058_s15 + $0x30] sm:$0xff]  ;;  %v3312_v12 = vld [vmem:[%s5058_s15 + $0x28] sm:$0xff] }
  0xca   : > { %1199 = vmatpush.bf16.msra.mxu0 %v3314_v7  ;;  %v3311_v13 = vld [vmem:[%s5058_s15 + $0x20] sm:$0xff]  ;;  %v3310_v14 = vld [vmem:[%s5058_s15 + $0x18] sm:$0xff]  ;;  %v3309_v15 = vld [vmem:[%s5058_s15 + $0x10] sm:$0xff] }
  0xcb   : > { %v3308_v16 = vld [vmem:[%s5058_s15 + $0x8] sm:$0xff]  ;;  %v3307_v17 = vld [vmem:[%s5058_s15] sm:$0xff]  ;;  %s5060_s24 = smov %s5059_s5 }
  0xcc   : > { %v1128_v18 = vld [vmem:[%s5059_s5] sm:$0xff]  ;;  %v1129_v19 = vld [vmem:[%s5060_s24 + $0x8] sm:$0xff] }
  0xcd   : > { %v1130_v20 = vpack.c.bf16 %v1129_v19, %v1128_v18 }
  0xce   : > { %1200 = vmatpush.bf16.msra.mxu0 %v3313_v9 }
  0xd1   : > { %1312 = vperm.xlu1 %3550, %v1297_v10   ;;  %1302 = vperm.xlu0 %3549, %v1295_v11  }
  0xd2   : > { %1201 = vmatpush.bf16.msra.mxu0 %v3312_v12 }
  0xd6   : > { %1202 = vmatpush.bf16.msra.mxu0 %v3311_v13 }
  0xda   : > { %1203 = vmatpush.bf16.msra.mxu0 %v3310_v14 }
  0xde   : > { %1204 = vmatpush.bf16.msra.mxu0 %v3309_v15 }
  0xe2   : > { %1205 = vmatpush.bf16.msra.mxu0 %v3308_v16 }
  0xe6   : > { %1206 = vmatpush.bf16.msra.mxu0 %v3307_v17 }
  0xe9   : > { %1207 = vmatmul.bf16.vlgmr.msra.gmra.mxu0 %v1130_v20 }
 0x13b   : > { %v1318_v23 = vpop.permute.xlu0 %1317  ;;  %v1308_v24 = vpop.permute.xlu1 %1307 }
 0x13c   : > { %v1326_v25 = vmul.f32 %v3551_v21, %v1318_v23  ;;  %v1324_v26 = vmul.f32 %v3551_v21, %v1308_v24 }
 0x13e   : > { %v1334_v27 = vadd.f32 %v3552_v22, %v1326_v25  ;;  %v4652_v28 = vadd.f32 %v3552_v22, %v1324_v26  ;;  %v3553_v26 = vld [vmem:[#allocation8] ss:$0 sm:$0xff] }
 0x140   : > { %v2995_v29 = vmul.f32 -1.442695, %v1334_v27  ;;  %v2993_v30 = vmul.f32 -1.442695, %v4652_v28 }
 0x142   : > { %3554 = vpow2.f32 %v2995_v29 }
 0x143   : > { %3556 = vpow2.f32 %v2993_v30  ;;  %v1313_v31 = vpop.permute.xlu1 %1312  ;;  %v1303_v32 = vpop.permute.xlu0 %1302 }
 0x144   : > { %v1325_v33 = vmul.f32 %v3551_v21, %v1313_v31  ;;  %v1323_v34 = vmul.f32 %v3551_v21, %v1303_v32 }
 0x146   : > { %v4655_v35 = vadd.f32 %v3552_v22, %v1325_v33  ;;  %v4657_v36 = vadd.f32 %v3552_v22, %v1323_v34 }
 0x148   : > { %v3555_v37 = vpop.eup %3554  ;;  %v2994_v38 = vmul.f32 -1.442695, %v4655_v35  ;;  %v2992_v41 = vmul.f32 -1.442695, %v4657_v36 }
 0x149   : > { %v3557_v39 = vpop.eup %3556  ;;  %v1350_v40 = vadd.f32 1.0, %v3555_v37 }
 0x14a   : > { %v1348_v42 = vadd.f32 1.0, %v3557_v39  ;;  %3558 = vpow2.f32 %v2994_v38 }
 0x14b   : > { %3560 = vrcp.f32 %v1350_v40  ;;  %vm1401_vm1 = vweird.f32 %v1350_v40  ;;  %v1405_v49 = vand.u32 2147483647, %v1350_v40  ;;  %v1407_v50 = vand.u32 2147483648, %v1350_v40 }
 0x14c   : > { %3562 = vrcp.f32 %v1348_v42  ;;  %v1377_v53 = vand.u32 2147483648, %v1348_v42  ;;  %vm1371_vm3 = vweird.f32 %v1348_v42  ;;  %v1375_v56 = vand.u32 2147483647, %v1348_v42 }
 0x14d   : > { %3564 = vpow2.f32 %v2992_v41  ;;  %v1408_v58 = vor.u32 1.1754944e-38, %v1407_v50  ;;  %vm1406_vm6 = vcmp.eq.f32.partialorder %v1405_v49, 8.507059e+37 }
 0x14e   : > { %v1378_v61 = vor.u32 1.1754944e-38, %v1377_v53  ;;  %vm1376_vm8 = vcmp.eq.f32.partialorder %v1375_v56, 8.507059e+37 }
 0x150   : > { %v3559_v43 = vpop.eup %3558 }
 0x151   : > { %v3561_v44 = vpop.eup %3560  ;;  %v1349_v45 = vadd.f32 1.0, %v3559_v43 }
 0x152   : > { %v3563_v46 = vpop.eup %3562  ;;  %v1397_v47 = vmul.f32 %v3561_v44, %v1350_v40  ;;  %vm1402_vm2 = vweird.f32 %v3561_v44 }
 0x153   : > { %v3565_v48 = vpop.eup %3564  ;;  %v1367_v51 = vmul.f32 %v3563_v46, %v1348_v42  ;;  %3566 = vrcp.f32 %v1349_v45  ;;  %vm1372_vm4 = vweird.f32 %v3563_v46  ;;  %vm1403_vm5 = vmor %vm1401_vm1, %vm1402_vm2  ;;  %v1392_v0 = vand.u32 2147483648, %v1349_v45 }
 0x154   : > { %v1398_v52 = vsub.f32 1.0, %v1397_v47  ;;  %v1347_v54 = vadd.f32 1.0, %v3565_v48  ;;  %vm1373_vm7 = vmor %vm1371_vm3, %vm1372_vm4  ;;  %vm1386_vm9 = vweird.f32 %v1349_v45  ;;  %v1390_v6 = vand.u32 2147483647, %v1349_v45 }
 0x155   : > { %v1368_v55 = vsub.f32 1.0, %v1367_v51  ;;  %v1393_v12 = vor.u32 1.1754944e-38, %v1392_v0 }
 0x156   : > { %v1399_v57 = vmul.f32 %v3561_v44, %v1398_v52  ;;  %3568 = vrcp.f32 %v1347_v54  ;;  %vm1356_vm11 = vweird.f32 %v1347_v54  ;;  %v1362_v16 = vand.u32 2147483648, %v1347_v54 }
 0x157   : > { %v1369_v59 = vmul.f32 %v3563_v46, %v1368_v55  ;;  %v1360_v19 = vand.u32 2147483647, %v1347_v54  ;;  %vm1391_vm14 = vcmp.eq.f32.partialorder %v1390_v6, 8.507059e+37 }
 0x158   : > { %v1400_v60 = vadd.f32 %v3561_v44, %v1399_v57  ;;  %v1363_v23 = vor.u32 1.1754944e-38, %v1362_v16 }
 0x159   : > { %v3567_v62 = vpop.eup %3566  ;;  %v1370_v63 = vadd.f32 %v3563_v46, %v1369_v59  ;;  %vm1361_vm0 = vcmp.eq.f32.partialorder %v1360_v19, 8.507059e+37 }
 0x15a   : > { %v1404_v1 = vsel %vm1403_vm5, %v3561_v44, %v1400_v60  ;;  %v1382_v2 = vmul.f32 %v3567_v62, %v1349_v45  ;;  %vm1387_vm10 = vweird.f32 %v3567_v62 }
 0x15b   : > { %v1409_v3 = vsel %vm1406_vm6, %v1408_v58, %v1404_v1  ;;  %v1374_v5 = vsel %vm1373_vm7, %v3563_v46, %v1370_v63  ;;  %vm1388_vm12 = vmor %vm1386_vm9, %vm1387_vm10 }
 0x15c   : > { %v3569_v7 = vpop.eup %3568  ;;  %v4662_v8 = vmul.f32 %v1409_v3, %v1334_v27  ;;  %v1379_v9 = vsel %vm1376_vm8, %v1378_v61, %v1374_v5  ;;  %v1383_v10 = vsub.f32 1.0, %v1382_v2 }
 0x15d   : > { %v4665_v11 = vmul.f32 %v1379_v9, %v4652_v28  ;;  %v1352_v13 = vmul.f32 %v3569_v7, %v1347_v54  ;;  %vm1357_vm13 = vweird.f32 %v3569_v7 }
 0x15e   : > { %v2999_v14 = vmul.f32 -1.442695, %v4662_v8  ;;  %v1384_v15 = vmul.f32 %v3567_v62, %v1383_v10  ;;  %vm1358_vm15 = vmor %vm1356_vm11, %vm1357_vm13 }
 0x15f   : > { %v2997_v17 = vmul.f32 -1.442695, %v4665_v11  ;;  %v1353_v18 = vsub.f32 1.0, %v1352_v13 }
 0x160   : > { %3570 = vpow2.f32 %v2999_v14  ;;  %v1385_v20 = vadd.f32 %v3567_v62, %v1384_v15 }
 0x161   : > { %3572 = vpow2.f32 %v2997_v17  ;;  %v1354_v21 = vmul.f32 %v3569_v7, %v1353_v18 }
 0x162   : > { %v1389_v22 = vsel %vm1388_vm12, %v3567_v62, %v1385_v20 }
 0x163   : > { %v1394_v24 = vsel %vm1391_vm14, %v1393_v12, %v1389_v22  ;;  %v1355_v25 = vadd.f32 %v3569_v7, %v1354_v21 }
 0x164   : > { %v4671_v27 = vmul.f32 %v1394_v24, %v4655_v35 }
 0x165   : > { %v1359_v28 = vsel %vm1358_vm15, %v3569_v7, %v1355_v25 }
 0x166   : > { %v3571_v29 = vpop.eup %3570  ;;  %v2998_v30 = vmul.f32 -1.442695, %v4671_v27  ;;  %v1364_v31 = vsel %vm1361_vm0, %v1363_v23, %v1359_v28  ;;  %v1208_v32 = vpop.f32.mrf.mxu0 }
 0x167   : > { %v3573_v33 = vpop.eup %3572  ;;  %v1430_v34 = vadd.f32 1.0, %v3571_v29  ;;  %v4675_v37 = vmul.f32 %v1364_v31, %v4657_v36  ;;  %v4677_v38 = vadd.f32 %v3553_v26, %v1208_v32 }
 0x168   : > { %v1428_v39 = vadd.f32 1.0, %v3573_v33  ;;  %3574 = vpow2.f32 %v2998_v30 }
 0x169   : > { %3576 = vrcp.f32 %v1430_v34  ;;  %v2996_v35 = vmul.f32 -1.442695, %v4675_v37  ;;  %v2988_v40 = vmul.f32 -1.442695, %v4677_v38  ;;  %vm1481_vm1 = vweird.f32 %v1430_v34 }
 0x16a   : > { %3578 = vrcp.f32 %v1428_v39  ;;  %v1485_v47 = vand.u32 2147483647, %v1430_v34  ;;  %v1487_v48 = vand.u32 2147483648, %v1430_v34  ;;  %v1457_v51 = vand.u32 2147483648, %v1428_v39 }
 0x16b   : > { %3580 = vpow2.f32 %v2996_v35  ;;  %vm1451_vm3 = vweird.f32 %v1428_v39  ;;  %v1455_v55 = vand.u32 2147483647, %v1428_v39 }
 0x16c   : > { %3582 = vpow2.f32 %v2988_v40  ;;  %v1488_v60 = vor.u32 1.1754944e-38, %v1487_v48  ;;  %vm1486_vm6 = vcmp.eq.f32.partialorder %v1485_v47, 8.507059e+37  ;;  %v1458_v0 = vor.u32 1.1754944e-38, %v1457_v51 }
 0x16d   : > { %vm1456_vm8 = vcmp.eq.f32.partialorder %v1455_v55, 8.507059e+37 }
 0x16e   : > { %v3575_v41 = vpop.eup %3574  ;;  %v1210_v42 = vpop.f32.mrf.mxu0 }
 0x16f   : > { %v3577_v43 = vpop.eup %3576  ;;  %v1429_v44 = vadd.f32 1.0, %v3575_v41  ;;  %v4681_v45 = vadd.f32 %v3553_v26, %v1210_v42 }
 0x170   : > { %v3579_v36 = vpop.eup %3578  ;;  %v1477_v46 = vmul.f32 %v3577_v43, %v1430_v34  ;;  %vm1482_vm2 = vweird.f32 %v3577_v43 }
 0x171   : > { %v1447_v49 = vmul.f32 %v3579_v36, %v1428_v39  ;;  %3584 = vrcp.f32 %v1429_v44  ;;  %v2989_v52 = vmul.f32 -1.442695, %v4681_v45  ;;  %v3581_v53 = vpop.eup %3580  ;;  %vm1452_vm4 = vweird.f32 %v3579_v36  ;;  %vm4687_vm5 = vmor %vm1481_vm1, %vm1482_vm2 }
 0x172   : > { %v1478_v50 = vsub.f32 1.0, %v1477_v46  ;;  %v3583_v56 = vpop.eup %3582  ;;  %v4684_v58 = vadd.f32 1.0, %v3581_v53  ;;  %vm1453_vm7 = vmor %vm1451_vm3, %vm1452_vm4  ;;  %v1470_v15 = vand.u32 2147483647, %v1429_v44  ;;  %v1472_v16 = vand.u32 2147483648, %v1429_v44 }
 0x173   : > { %v1448_v54 = vsub.f32 1.0, %v1447_v49  ;;  %v4691_v62 = vadd.f32 1.0, %v3583_v56  ;;  %3586 = vpow2.f32 %v2989_v52  ;;  %vm1466_vm10 = vweird.f32 %v1429_v44 }
 0x174   : > { %v1479_v57 = vmul.f32 %v3577_v43, %v1478_v50  ;;  %3588 = vrcp.f32 %v4684_v58  ;;  %vm1471_vm12 = vcmp.eq.f32.partialorder %v1470_v15, 8.507059e+37  ;;  %v1440_v26 = vand.u32 2147483647, %v4684_v58 }
 0x175   : > { %v1449_v61 = vmul.f32 %v3579_v36, %v1448_v54  ;;  %3590 = vrcp.f32 %v4691_v62  ;;  %v1442_v28 = vand.u32 2147483648, %v4684_v58  ;;  %v1232_v32 = vand.u32 2147483648, %v4691_v62 }
 0x176   : > { %v1480_v63 = vadd.f32 %v3577_v43, %v1479_v57  ;;  %v1230_v39 = vand.u32 2147483647, %v4691_v62  ;;  %vm1436_vm15 = vweird.f32 %v4684_v58  ;;  %vm1226_vm1 = vweird.f32 %v4691_v62 }
 0x177   : > { %v3585_v1 = vpop.eup %3584  ;;  %v1450_v2 = vadd.f32 %v3579_v36, %v1449_v61  ;;  %v1443_v41 = vor.u32 1.1754944e-38, %v1442_v28  ;;  %vm1441_vm2 = vcmp.eq.f32.partialorder %v1440_v26, 8.507059e+37 }
 0x178   : > { %v1484_v3 = vsel %vm4687_vm5, %v3577_v43, %v1480_v63  ;;  %v1462_v5 = vmul.f32 %v3585_v1, %v1429_v44  ;;  %vm1467_vm9 = vweird.f32 %v3585_v1  ;;  %v1233_v44 = vor.u32 1.1754944e-38, %v1232_v32 }
 0x179   : > { %v1489_v6 = vsel %vm1486_vm6, %v1488_v60, %v1484_v3  ;;  %v1454_v7 = vsel %vm1453_vm7, %v3579_v36, %v1450_v2  ;;  %v3587_v13 = vpop.eup %3586  ;;  %vm1468_vm11 = vmor %vm1466_vm10, %vm1467_vm9  ;;  %vm1231_vm4 = vcmp.eq.f32.partialorder %v1230_v39, 8.507059e+37 }
 0x17a   : > { %v1494_v9 = vmul.f32 %v1489_v6, %v4662_v8  ;;  %v1459_v10 = vsel %vm1456_vm8, %v1458_v0, %v1454_v7  ;;  %v1463_v12 = vsub.f32 1.0, %v1462_v5  ;;  %v3589_v17 = vpop.eup %3588  ;;  %v1220_v20 = vadd.f32 1.0, %v3587_v13 }
 0x17b   : > { %v1492_v14 = vmul.f32 %v1459_v10, %v4665_v11  ;;  %v3591_v21 = vpop.eup %3590  ;;  %v1432_v22 = vmul.f32 %v3589_v17, %v4684_v58  ;;  %v1473_v11 = vor.u32 1.1754944e-38, %v1472_v16  ;;  %vm1437_vm13 = vweird.f32 %v3589_v17 }
 0x17c   : > { %v1498_v18 = vmul.f32 %v4606_v4, %v1494_v9  ;;  %v1464_v19 = vmul.f32 %v3585_v1, %v1463_v12  ;;  %v1222_v8 = vmul.f32 %v3591_v21, %v4691_v62  ;;  %3592 = vrcp.f32 %v1220_v20  ;;  %vm1438_vm0 = vmor %vm1436_vm15, %vm1437_vm13 }
 0x17d   : > { %1500 = vst [vmem:[#allocation3 + $0x10] sm:$0xff] %v1492_v14  ;;  %v1433_v24 = vsub.f32 1.0, %v1432_v22  ;;  %vm1227_vm14 = vweird.f32 %v3591_v21  ;;  %v1247_v51 = vand.u32 2147483648, %v1220_v20  ;;  %v1245_v53 = vand.u32 2147483647, %v1220_v20 }
 0x17e   : > { %1502 = vst [vmem:[#allocation3 + $0x18] sm:$0xff] %v1498_v18  ;;  %v1465_v23 = vadd.f32 %v3585_v1, %v1464_v19  ;;  %v1223_v29 = vsub.f32 1.0, %v1222_v8  ;;  %vm1228_vm3 = vmor %vm1226_vm1, %vm1227_vm14  ;;  %vm1241_vm6 = vweird.f32 %v1220_v20 }
 0x17f   : > { %v1434_v31 = vmul.f32 %v3589_v17, %v1433_v24  ;;  %v1248_v56 = vor.u32 1.1754944e-38, %v1247_v51  ;;  %vm1246_vm8 = vcmp.eq.f32.partialorder %v1245_v53, 8.507059e+37 }
 0x180   : > { %v1469_v25 = vsel %vm1468_vm11, %v3585_v1, %v1465_v23  ;;  %v1224_v34 = vmul.f32 %v3591_v21, %v1223_v29 }
 0x181   : > { %v1474_v30 = vsel %vm1471_vm12, %v1473_v11, %v1469_v25  ;;  %v1435_v35 = vadd.f32 %v3589_v17, %v1434_v31 }
 0x182   : > { %v1493_v33 = vmul.f32 %v1474_v30, %v4671_v27  ;;  %v3593_v40 = vpop.eup %3592  ;;  %v1225_v42 = vadd.f32 %v3591_v21, %v1224_v34 }
 0x183   : > { %v1439_v43 = vsel %vm1438_vm0, %v3589_v17, %v1435_v35  ;;  %v1237_v36 = vmul.f32 %v3593_v40, %v1220_v20  ;;  %vm1242_vm5 = vweird.f32 %v3593_v40 }
 0x184   : > { %1501 = vst [vmem:[#allocation3] sm:$0xff] %v1493_v33  ;;  %v1444_v27 = vsel %vm1441_vm2, %v1443_v41, %v1439_v43  ;;  %v1229_v46 = vsel %vm1228_vm3, %v3591_v21, %v1225_v42  ;;  %vm1243_vm7 = vmor %vm1241_vm6, %vm1242_vm5 }
 0x185   : > { %v1491_v47 = vmul.f32 %v1444_v27, %v4675_v37  ;;  %v1234_v48 = vsel %vm1231_vm4, %v1233_v44, %v1229_v46  ;;  %v1238_v49 = vsub.f32 1.0, %v1237_v36 }
 0x186   : > { %v1251_v50 = vmul.f32 %v1234_v48, %v4677_v38 }
 0x187   : > { %1499 = vst [vmem:[#allocation3 + $0x8] sm:$0xff] %v1491_v47  ;;  %v1239_v52 = vmul.f32 %v3593_v40, %v1238_v49 }
 0x188   : > { %v2990_v54 = vmul.f32 -1.442695, %v1251_v50 }
 0x189   : > { %v1240_v55 = vadd.f32 %v3593_v40, %v1239_v52 }
 0x18a   : > { %3594 = vpow2.f32 %v2990_v54 }
 0x18b   : > { %v1244_v57 = vsel %vm1243_vm7, %v3593_v40, %v1240_v55 }
 0x18c   : > { %v1249_v58 = vsel %vm1246_vm8, %v1248_v56, %v1244_v57 }
 0x18d   : > { %v1252_v37 = vmul.f32 %v1249_v58, %v4681_v45 }
 0x18f   : > { %v2991_v59 = vmul.f32 -1.442695, %v1252_v37 }
 0x190   : > { %v3595_v60 = vpop.eup %3594 }
 0x191   : > { %v1259_v61 = vadd.f32 1.0, %v3595_v60  ;;  %3596 = vpow2.f32 %v2991_v59 }
 0x193   : > { %3598 = vrcp.f32 %v1259_v61  ;;  %v1272_v2 = vand.u32 2147483648, %v1259_v61  ;;  %v1270_v5 = vand.u32 2147483647, %v1259_v61  ;;  %vm1266_vm10 = vweird.f32 %v1259_v61 }
 0x195   : > { %v1273_v45 = vor.u32 1.1754944e-38, %v1272_v2  ;;  %vm1271_vm12 = vcmp.eq.f32.partialorder %v1270_v5, 8.507059e+37 }
 0x197   : > { %v3597_v38 = vpop.eup %3596 }
 0x198   : > { %v1260_v62 = vadd.f32 1.0, %v3597_v38 }
 0x199   : > { %v3599_v63 = vpop.eup %3598 }
 0x19a   : > { %v1262_v0 = vmul.f32 %v3599_v63, %v1259_v61  ;;  %3600 = vrcp.f32 %v1260_v62  ;;  %vm1267_vm9 = vweird.f32 %v3599_v63  ;;  %v1287_v15 = vand.u32 2147483648, %v1260_v62 }
 0x19b   : > { %vm1268_vm11 = vmor %vm1266_vm10, %vm1267_vm9  ;;  %v1285_v17 = vand.u32 2147483647, %v1260_v62  ;;  %vm1281_vm14 = vweird.f32 %v1260_v62 }
 0x19c   : > { %v1263_v1 = vsub.f32 1.0, %v1262_v0  ;;  %v1288_v19 = vor.u32 1.1754944e-38, %v1287_v15 }
 0x19d   : > { %vm1286_vm0 = vcmp.eq.f32.partialorder %v1285_v17, 8.507059e+37 }
 0x19e   : > { %v1264_v3 = vmul.f32 %v3599_v63, %v1263_v1 }
 0x1a0   : > { %v3601_v6 = vpop.eup %3600  ;;  %v1265_v7 = vadd.f32 %v3599_v63, %v1264_v3 }
 0x1a1   : > { %v1277_v9 = vmul.f32 %v3601_v6, %v1260_v62  ;;  %vm1282_vm13 = vweird.f32 %v3601_v6 }
 0x1a2   : > { %v1269_v10 = vsel %vm1268_vm11, %v3599_v63, %v1265_v7  ;;  %vm1283_vm15 = vmor %vm1281_vm14, %vm1282_vm13 }
 0x1a3   : > { %v1274_v12 = vsel %vm1271_vm12, %v1273_v45, %v1269_v10  ;;  %v1278_v13 = vsub.f32 1.0, %v1277_v9 }
 0x1a4   : > { %v1291_v14 = vmul.f32 %v1274_v12, %v1251_v50 }
 0x1a5   : > { %v1279_v16 = vmul.f32 %v3601_v6, %v1278_v13 }
 0x1a6   : > { %1293 = vst [vmem:[#allocation2] sm:$0xff] %v1291_v14 }
 0x1a7   : > { %v1280_v18 = vadd.f32 %v3601_v6, %v1279_v16 }
 0x1a9   : > { %v1284_v20 = vsel %vm1283_vm15, %v3601_v6, %v1280_v18 }
 0x1aa   : > { %v1289_v21 = vsel %vm1286_vm0, %v1288_v19, %v1284_v20 }
 0x1ab   : > { %v1292_v22 = vmul.f32 %v1289_v21, %v1252_v37 }
 0x1ad   : > { %1294 = vst [vmem:[#allocation2 + $0x8] sm:$0xff] %v1292_v22 }
 0x1ae PF: > { %v3058_v23 = vld [vmem:[%s4568_s16 + $0x70] sm:$0xf]  ;;  %v3330_v8 = vld [vmem:[%s4568_s16 + $0x74] sm:$0xf0]  ;;  %v3329_v11 = vld [vmem:[%s4568_s16 + $0x74] sm:$0xf] }
 0x1af   : > { %v3059_v24 = vor.u32 %v3330_v8, %v3058_v23  ;;  %v3060_v25 = vld [vmem:[%s4568_s16 + $0x78] sm:$0xf0]  ;;  %v3050_v26 = vld [vmem:[%s4568_s16 + $0x60] sm:$0xf]  ;;  %v3328_v28 = vld [vmem:[%s4568_s16 + $0x64] sm:$0xf0] }
 0x1b0   : > { %v3063_v29 = vor.u32 %v3329_v11, %v3060_v25  ;;  %v3327_v30 = vld [vmem:[%s4568_s16 + $0x64] sm:$0xf]  ;;  %v3052_v31 = vld [vmem:[%s4568_s16 + $0x68] sm:$0xf0]  ;;  %v3051_v32 = vor.u32 %v3328_v28, %v3050_v26  ;;  %v3042_v34 = vld [vmem:[%s4568_s16 + $0x50] sm:$0xf] }
 0x1b1   : > { %1602 = vmatpush.bf16.msra.mxu0 %v3059_v24  ;;  %v3055_v33 = vor.u32 %v3327_v30, %v3052_v31  ;;  %v3326_v39 = vld [vmem:[%s4568_s16 + $0x54] sm:$0xf0]  ;;  %v3325_v35 = vld [vmem:[%s4568_s16 + $0x54] sm:$0xf]  ;;  %v3044_v40 = vld [vmem:[%s4568_s16 + $0x58] sm:$0xf0] }
 0x1b2   : > { %1616 = vmatpush.bf16.msra.mxu1 %v3063_v29  ;;  %v3043_v41 = vor.u32 %v3326_v39, %v3042_v34  ;;  %v3047_v42 = vor.u32 %v3325_v35, %v3044_v40  ;;  %v3034_v43 = vld [vmem:[%s4568_s16 + $0x40] sm:$0xf]  ;;  %v3324_v44 = vld [vmem:[%s4568_s16 + $0x44] sm:$0xf0]  ;;  %v3323_v36 = vld [vmem:[%s4568_s16 + $0x44] sm:$0xf] }
 0x1b3   : > { %v3036_v27 = vld [vmem:[%s4568_s16 + $0x48] sm:$0xf0]  ;;  %v3026_v46 = vld [vmem:[%s4568_s16 + $0x30] sm:$0xf]  ;;  %v3035_v47 = vor.u32 %v3324_v44, %v3034_v43  ;;  %v3322_v48 = vld [vmem:[%s4568_s16 + $0x34] sm:$0xf0] }
 0x1b4   : > { %v3039_v49 = vor.u32 %v3323_v36, %v3036_v27  ;;  %v3321_v50 = vld [vmem:[%s4568_s16 + $0x34] sm:$0xf]  ;;  %v3028_v51 = vld [vmem:[%s4568_s16 + $0x38] sm:$0xf0]  ;;  %v3027_v52 = vor.u32 %v3322_v48, %v3026_v46  ;;  %v3018_v54 = vld [vmem:[%s4568_s16 + $0x20] sm:$0xf] }
 0x1b5   : > { %1603 = vmatpush.bf16.msra.mxu0 %v3051_v32  ;;  %v3031_v53 = vor.u32 %v3321_v50, %v3028_v51  ;;  %v3320_v55 = vld [vmem:[%s4568_s16 + $0x24] sm:$0xf0]  ;;  %v3319_v56 = vld [vmem:[%s4568_s16 + $0x24] sm:$0xf]  ;;  %v3020_v57 = vld [vmem:[%s4568_s16 + $0x28] sm:$0xf0] }
 0x1b6   : > { %1617 = vmatpush.bf16.msra.mxu1 %v3055_v33  ;;  %v3019_v58 = vor.u32 %v3320_v55, %v3018_v54  ;;  %v3023_v37 = vor.u32 %v3319_v56, %v3020_v57  ;;  %v3010_v59 = vld [vmem:[%s4568_s16 + $0x10] sm:$0xf]  ;;  %v3318_v60 = vld [vmem:[%s4568_s16 + $0x14] sm:$0xf0]  ;;  %v3317_v61 = vld [vmem:[%s4568_s16 + $0x14] sm:$0xf] }
 0x1b7   : > { %v3012_v38 = vld [vmem:[%s4568_s16 + $0x18] sm:$0xf0]  ;;  %v3011_v62 = vor.u32 %v3318_v60, %v3010_v59  ;;  %v3002_v0 = vld [vmem:[%s4568_s16] sm:$0xf]  ;;  %v3316_v1 = vld [vmem:[%s4568_s16 + $0x4] sm:$0xf0] }
 0x1b8   : > { %v3015_v63 = vor.u32 %v3317_v61, %v3012_v38  ;;  %v3315_v2 = vld [vmem:[%s4568_s16 + $0x4] sm:$0xf]  ;;  %v3004_v3 = vld [vmem:[%s4568_s16 + $0x8] sm:$0xf0]  ;;  %v3003_v5 = vor.u32 %v3316_v1, %v3002_v0  ;;  %v3342_v21 = vld [vmem:[%s4574_s0 + $0x38] sm:$0xff]  ;;  %s5063_s3 = sld [smem:[#allocation43_spill]] }
 0x1b9   : > { %1604 = vmatpush.bf16.msra.mxu0 %v3043_v41  ;;  %v4744_v6 = vld [vmem:[#allocation2] sm:$0xff]  ;;  %v4746_v7 = vld [vmem:[#allocation2 + $0x8] sm:$0xff]  ;;  %v3007_v45 = vor.u32 %v3315_v2, %v3004_v3  ;;  %s5064_s9 = sld [smem:[#allocation42_spill]]  ;;  %vm1656_vm1 = vcmask 130048   ;;  %v3341_v24 = vld [vmem:[%s4574_s0 + $0x30] sm:$0xff] }
 0x1ba   : > { %1618 = vmatpush.bf16.msra.mxu1 %v3047_v42  ;;  %v1505_v9 = vpack.c.bf16 %v4746_v7, %v4744_v6  ;;  %v3340_v25 = vld [vmem:[%s4574_s0 + $0x28] sm:$0xff]  ;;  %v3339_v26 = vld [vmem:[%s4574_s0 + $0x20] sm:$0xff]  ;;  %v3338_v28 = vld [vmem:[%s4574_s0 + $0x18] sm:$0xff] }
 0x1bb   : > { %v3337_v31 = vld [vmem:[%s4574_s0 + $0x10] sm:$0xff]  ;;  %v3336_v32 = vld [vmem:[%s4574_s0 + $0x8] sm:$0xff]  ;;  %v3335_v33 = vld [vmem:[%s4574_s0] sm:$0xff] }
 0x1bc   : > { %v4774_v34 = vld [vmem:[#allocation3 + $0x8] sm:$0xff]  ;;  %v4776_v39 = vld [vmem:[#allocation3 + $0x10] sm:$0xff]  ;;  %v4780_v40 = vld [vmem:[#allocation3] sm:$0xff] }
 0x1bd   : > { %1605 = vmatpush.bf16.msra.mxu0 %v3035_v47  ;;  %v1725_v35 = vpack.c.bf16 %v4776_v39, %v4774_v34  ;;  %v4782_v41 = vld [vmem:[#allocation3 + $0x18] sm:$0xff]  ;;  %v3350_v36 = vld [vmem:[%s4576_s2 + $0x38] sm:$0xff]  ;;  %v3349_v46 = vld [vmem:[%s4576_s2 + $0x30] sm:$0xff] }
 0x1be   : > { %1619 = vmatpush.bf16.msra.mxu1 %v3039_v49  ;;  %v3333_v8 = vld [vmem:[%s5063_s3] sm:$0xff]  ;;  %v3334_v29 = vld [vmem:[%s5063_s3 + $0x8] sm:$0xff]  ;;  %v1726_v42 = vpack.c.bf16 %v4782_v41, %v4780_v40  ;;  %v3345_v56 = vld [vmem:[%s4576_s2 + $0x10] sm:$0xff] }
 0x1bf   : > { %v3331_v11 = vld [vmem:[%s5064_s9] sm:$0xff]  ;;  %v3332_v30 = vld [vmem:[%s5064_s9 + $0x8] sm:$0xff] }
 0x1c0   : > { %v3348_v47 = vld [vmem:[%s4576_s2 + $0x28] sm:$0xff]  ;;  %v3347_v50 = vld [vmem:[%s4576_s2 + $0x20] sm:$0xff]  ;;  %v3346_v51 = vld [vmem:[%s4576_s2 + $0x18] sm:$0xff] }
 0x1c1   : > { %1606 = vmatpush.bf16.msra.mxu0 %v3027_v52  ;;  %v3343_v38 = vld [vmem:[%s4576_s2] sm:$0xff] }
 0x1c2   : > { %1620 = vmatpush.bf16.msra.mxu1 %v3031_v53  ;;  %v3602_v53 = vld [vmem:[%s1093_s10] ss:$0 sm:$0xff] }
 0x1c5   : > { %1607 = vmatpush.bf16.msra.mxu0 %v3019_v58 }
 0x1c6   : > { %1621 = vmatpush.bf16.msra.mxu1 %v3023_v37  ;;  %v3344_v37 = vld [vmem:[%s4576_s2 + $0x8] sm:$0xff] }
 0x1c9   : > { %1608 = vmatpush.bf16.msra.mxu0 %v3011_v62 }
 0x1ca   : > { %1622 = vmatpush.bf16.msra.mxu1 %v3015_v63 }
 0x1cd   : > { %1609 = vmatpush.bf16.msra.mxu0 %v3003_v5 }
 0x1ce   : > { %1623 = vmatpush.bf16.msra.mxu1 %v3007_v45 }
 0x1d0   : > { %1610 = vmatmul.bf16.vlgmr.msra.gmra.mxu0 %v1505_v9 }
 0x1d1   : > { %1624 = vmatmul.bf16.vlgmr.msra.gmra.mxu1 %v1505_v9 }
 0x24d   : > { %v1611_v10 = vpop.f32.mrf.mxu0 }
 0x24e   : > { %v1625_v12 = vpop.f32.mrf.mxu1 }
 0x24f   : > { %v1630_v13 = vpack.c.bf16 %v1625_v12, %v1611_v10 }
 0x251   : > { %v1652_v17 = vunpack.c.h.b16 %v1630_v13  ;;  %v1692_v19 = vunpack.c.l.b16 %v1630_v13 }
 0x255   : > { %v1613_v14 = vpop.f32.mrf.mxu0 }
 0x256   : > { %v1627_v15 = vpop.f32.mrf.mxu1 }
 0x257   : > { %v1631_v16 = vpack.c.bf16 %v1627_v15, %v1613_v14 }
 0x259   : > { %v1653_v18 = vunpack.c.h.b16 %v1631_v16  ;;  %v1693_v20 = vunpack.c.l.b16 %v1631_v16 }
 0x25b   : > { %v1654_v22 = vpack.c.b16 %v1653_v18, %v1652_v17  ;;  %v1694_v23 = vpack.c.b16 %v1693_v20, %v1692_v19 }
 0x25d   : > { %1670 = vmatpush.bf16.msra.mxu2 %v1654_v22  ;;  %1709 = vmatpush.bf16.msra.mxu3 %v1694_v23 }
 0x260   : > { %3072 = vmatmul.msk.bf16.vlgmr.msra.gmra.mxu2 %vm1656_vm1, %v3333_v8  ;;  %3082 = vmatmul.msk.bf16.vlgmr.msra.gmra.mxu3 %vm1656_vm1, %v3331_v11 }
 0x261   : > { %1791 = vmatpush.bf16.msrb.mxu2 %v3342_v21  ;;  %1972 = vmatpush.bf16.msrb.mxu3 %v3350_v36 }
 0x265   : > { %1792 = vmatpush.bf16.msrb.mxu2 %v3341_v24  ;;  %1973 = vmatpush.bf16.msrb.mxu3 %v3349_v46 }
 0x269   : > { %1793 = vmatpush.bf16.msrb.mxu2 %v3340_v25  ;;  %1974 = vmatpush.bf16.msrb.mxu3 %v3348_v47 }
 0x26d   : > { %1794 = vmatpush.bf16.msrb.mxu2 %v3339_v26  ;;  %1975 = vmatpush.bf16.msrb.mxu3 %v3347_v50 }
 0x270   : > { %3073 = vmatmul.msk.bf16.gmra.mxu2 %vm1656_vm1, %v3334_v29  ;;  %3083 = vmatmul.msk.bf16.gmra.mxu3 %vm1656_vm1, %v3332_v30 }
 0x271   : > { %1795 = vmatpush.bf16.msrb.mxu2 %v3338_v28  ;;  %1976 = vmatpush.bf16.msrb.mxu3 %v3346_v51 }
 0x275   : > { %1796 = vmatpush.bf16.msrb.mxu2 %v3337_v31  ;;  %1977 = vmatpush.bf16.msrb.mxu3 %v3345_v56 }
 0x279   : > { %1797 = vmatpush.bf16.msrb.mxu2 %v3336_v32  ;;  %1978 = vmatpush.bf16.msrb.mxu3 %v3344_v37 }
 0x27d   : > { %1798 = vmatpush.bf16.msrb.mxu2 %v3335_v33  ;;  %1979 = vmatpush.bf16.msrb.mxu3 %v3343_v38 }
 0x280   : > { %1799 = vmatmul.bf16.vlgmr.msrb.gmra.mxu2 %v1725_v35 }
 0x290   : > { %1804 = vmatmul.bf16.gmra.mxu2 %v1726_v42 }
 0x2e3   : > { %v1672_v43 = vpop.f32.mrf.mxu2  ;;  %v1711_v48 = vpop.f32.mrf.mxu3 }
 0x2e4   : > { %v1712_v52 = vadd.f32 %v1711_v48, %v1672_v43 }
 0x2eb   : > { %v1674_v44 = vpop.f32.mrf.mxu2  ;;  %v1713_v54 = vpop.f32.mrf.mxu3 }
 0x2ec   : > { %v1714_v60 = vadd.f32 %v1713_v54, %v1674_v44 }
 0x2f3   : > { %v1677_v27 = vpop.f32.mrf.mxu2  ;;  %v1716_v63 = vpop.f32.mrf.mxu3 }
 0x2f4   : > { %v1717_v5 = vadd.f32 %v1716_v63, %v1677_v27 }
 0x2fb   : > { %v1679_v49 = vpop.f32.mrf.mxu2  ;;  %v1718_v12 = vpop.f32.mrf.mxu3 }
 0x2fc   : > { %v1719_v17 = vadd.f32 %v1718_v12, %v1679_v49 }
 0x303   : > { %v1800_v55 = vpop.f32.mrf.mxu2 }
 0x304   : > { %v1810_v57 = vadd.f32 %v1800_v55, %v1712_v52 }
 0x306   : > { %v4797_v58 = vadd.f32 %v3602_v53, %v1810_v57 }
 0x308   : > { %v3116_v59 = vmul.f32 -1.442695, %v4797_v58 }
 0x30a   : > { %3607 = vpow2.f32 %v3116_v59 }
 0x30b   : > { %v1802_v61 = vpop.f32.mrf.mxu2 }
 0x30c   : > { %v1811_v62 = vadd.f32 %v1802_v61, %v1714_v60 }
 0x30e   : > { %v1819_v0 = vadd.f32 %v3602_v53, %v1811_v62 }
 0x310   : > { %v3608_v1 = vpop.eup %3607  ;;  %v3117_v2 = vmul.f32 -1.442695, %v1819_v0 }
 0x311   : > { %v1834_v3 = vadd.f32 1.0, %v3608_v1 }
 0x312   : > { %3609 = vpow2.f32 %v3117_v2 }
 0x313   : > { %3611 = vrcp.f32 %v1834_v3  ;;  %v1805_v45 = vpop.f32.mrf.mxu2  ;;  %v1849_v29 = vand.u32 2147483648, %v1834_v3  ;;  %vm1843_vm3 = vweird.f32 %v1834_v3  ;;  %v1847_v30 = vand.u32 2147483647, %v1834_v3 }
 0x314   : > { %v1812_v9 = vadd.f32 %v1805_v45, %v1717_v5 }
 0x315   : > { %v1850_v43 = vor.u32 1.1754944e-38, %v1849_v29  ;;  %vm1848_vm6 = vcmp.eq.f32.partialorder %v1847_v30, 8.507059e+37 }
 0x316   : > { %v4802_v10 = vadd.f32 %v3602_v53, %v1812_v9 }
 0x318   : > { %v3610_v13 = vpop.eup %3609  ;;  %v3118_v14 = vmul.f32 -1.442695, %v4802_v10 }
 0x319   : > { %v3612_v15 = vpop.eup %3611  ;;  %v1835_v16 = vadd.f32 1.0, %v3610_v13 }
 0x31a   : > { %v1839_v18 = vmul.f32 %v3612_v15, %v1834_v3  ;;  %3613 = vpow2.f32 %v3118_v14  ;;  %vm1844_vm2 = vweird.f32 %v3612_v15 }
 0x31b   : > { %3615 = vrcp.f32 %v1835_v16  ;;  %v1807_v19 = vpop.f32.mrf.mxu2  ;;  %vm1845_vm4 = vmor %vm1843_vm3, %vm1844_vm2  ;;  %v1864_v32 = vand.u32 2147483648, %v1835_v16  ;;  %v1862_v42 = vand.u32 2147483647, %v1835_v16  ;;  %vm1858_vm7 = vweird.f32 %v1835_v16 }
 0x31c   : > { %v1840_v20 = vsub.f32 1.0, %v1839_v18  ;;  %v1813_v21 = vadd.f32 %v1807_v19, %v1719_v17 }
 0x31d   : > { %v1865_v47 = vor.u32 1.1754944e-38, %v1864_v32  ;;  %vm1863_vm9 = vcmp.eq.f32.partialorder %v1862_v42, 8.507059e+37 }
 0x31e   : > { %v1841_v22 = vmul.f32 %v3612_v15, %v1840_v20  ;;  %v4805_v23 = vadd.f32 %v3602_v53, %v1813_v21 }
 0x320   : > { %v3614_v8 = vpop.eup %3613  ;;  %v3119_v11 = vmul.f32 -1.442695, %v4805_v23  ;;  %v1842_v26 = vadd.f32 %v3612_v15, %v1841_v22 }
 0x321   : > { %v3616_v24 = vpop.eup %3615  ;;  %v1836_v25 = vadd.f32 1.0, %v3614_v8 }
 0x322   : > { %v1854_v28 = vmul.f32 %v3616_v24, %v1835_v16  ;;  %3617 = vpow2.f32 %v3119_v11  ;;  %v1846_v33 = vsel %vm1845_vm4, %v3612_v15, %v1842_v26  ;;  %vm1859_vm5 = vweird.f32 %v3616_v24  ;;  %v3603_v15 = vld [vmem:[%s1096_s8] ss:$0 sm:$0xff] }
 0x323   : > { %3619 = vrcp.f32 %v1836_v25  ;;  %v1851_v46 = vsel %vm1848_vm6, %v1850_v43, %v1846_v33  ;;  %vm1860_vm8 = vmor %vm1858_vm7, %vm1859_vm5  ;;  %v1879_v60 = vand.u32 2147483648, %v1836_v25  ;;  %vm1873_vm11 = vweird.f32 %v1836_v25 }
 0x324   : > { %v1855_v31 = vsub.f32 1.0, %v1854_v28  ;;  %v1898_v52 = vmul.f32 %v1851_v46, %v4797_v58  ;;  %v1877_v61 = vand.u32 2147483647, %v1836_v25 }
 0x326   : > { %v1856_v35 = vmul.f32 %v3616_v24, %v1855_v31  ;;  %vm1878_vm14 = vcmp.eq.f32.partialorder %v1877_v61, 8.507059e+37 }
 0x328   : > { %v3618_v44 = vpop.eup %3617  ;;  %v1857_v36 = vadd.f32 %v3616_v24, %v1856_v35 }
 0x329   : > { %v3620_v27 = vpop.eup %3619  ;;  %v1837_v48 = vadd.f32 1.0, %v3618_v44 }
 0x32a   : > { %v1861_v49 = vsel %vm1860_vm8, %v3616_v24, %v1857_v36  ;;  %v1869_v50 = vmul.f32 %v3620_v27, %v1836_v25  ;;  %vm1874_vm10 = vweird.f32 %v3620_v27 }
 0x32b   : > { %v1866_v51 = vsel %vm1863_vm9, %v1865_v47, %v1861_v49  ;;  %3621 = vrcp.f32 %v1837_v48  ;;  %vm1875_vm12 = vmor %vm1873_vm11, %vm1874_vm10  ;;  %v1894_v62 = vand.u32 2147483648, %v1837_v48  ;;  %v1892_v58 = vand.u32 2147483647, %v1837_v48  ;;  %v4827_v49 = vld [vmem:[%s1099_s27] ss:$0 sm:$0xff]  ;;  %s5068_s27 = sld [smem:[#allocation36_spill]] }
 0x32c   : > { %v1899_v53 = vmul.f32 %v1866_v51, %v1819_v0  ;;  %v1870_v54 = vsub.f32 1.0, %v1869_v50  ;;  %v1880_v0 = vor.u32 1.1754944e-38, %v1879_v60  ;;  %vm1888_vm15 = vweird.f32 %v1837_v48 }
 0x32d   : > { %v1895_v5 = vor.u32 1.1754944e-38, %v1894_v62  ;;  %vm1893_vm1 = vcmp.eq.f32.partialorder %v1892_v58, 8.507059e+37 }
 0x32e   : > { %v1902_v55 = vpack.c.bf16 %v1899_v53, %v1898_v52  ;;  %v1871_v56 = vmul.f32 %v3620_v27, %v1870_v54 }
 0x330   : > { %1980 = vmatmul.bf16.vlgmr.msrb.gmra.mxu3 %v1902_v55  ;;  %v1872_v37 = vadd.f32 %v3620_v27, %v1871_v56 }
 0x331   : > { %v3622_v57 = vpop.eup %3621  ;;  %s2099_s26 = sld [smem:[#allocation19 + %s5068_s27]]  ;;  %p3231_p3 = scmp.ne.s32.totalorder %s5068_s27, 3 }
 0x332   : > { %v1884_v59 = vmul.f32 %v3622_v57, %v1837_v48  ;;  %v1876_v63 = vsel %vm1875_vm12, %v3620_v27, %v1872_v37  ;;  %vm1889_vm13 = vweird.f32 %v3622_v57 }
 0x333   : > { %v1881_v3 = vsel %vm1878_vm14, %v1880_v0, %v1876_v63  ;;  %vm1890_vm0 = vmor %vm1888_vm15, %vm1889_vm13 }
 0x334   : > { %v1885_v38 = vsub.f32 1.0, %v1884_v59  ;;  %v1900_v12 = vmul.f32 %v1881_v3, %v4802_v10 }
 0x336   : > { %v1886_v1 = vmul.f32 %v3622_v57, %v1885_v38 }
 0x338   : > { %v1887_v2 = vadd.f32 %v3622_v57, %v1886_v1 }
 0x33a   : > { %v1891_v45 = vsel %vm1890_vm0, %v3622_v57, %v1887_v2 }
 0x33b   : > { %v1896_v9 = vsel %vm1893_vm1, %v1895_v5, %v1891_v45 }
 0x33c   : > { %v1901_v13 = vmul.f32 %v1896_v9, %v4805_v23 }
 0x33e   : > { %v1903_v14 = vpack.c.bf16 %v1901_v13, %v1900_v12 }
 0x340   : > { %1985 = vmatmul.bf16.gmra.mxu3 %v1903_v14 }
 0x3b3   : > { %v1981_v16 = vpop.f32.mrf.mxu3 }
 0x3b4   : > { %v1982_v17 = vadd.f32 %v3603_v15, %v1981_v16 }
 0x3b6   : > { %v3152_v18 = vmul.f32 -1.442695, %v1982_v17 }
 0x3b8   : > { %3623 = vpow2.f32 %v3152_v18 }
 0x3bb   : > { %v1983_v19 = vpop.f32.mrf.mxu3 }
 0x3bc   : > { %v1984_v20 = vadd.f32 %v3603_v15, %v1983_v19 }
 0x3be   : > { %v3624_v21 = vpop.eup %3623  ;;  %v3153_v22 = vmul.f32 -1.442695, %v1984_v20 }
 0x3bf   : > { %v2003_v8 = vadd.f32 1.0, %v3624_v21 }
 0x3c0   : > { %3625 = vpow2.f32 %v3153_v22 }
 0x3c1   : > { %3627 = vrcp.f32 %v2003_v8  ;;  %v2018_v30 = vand.u32 2147483648, %v2003_v8  ;;  %v2016_v33 = vand.u32 2147483647, %v2003_v8  ;;  %vm2012_vm3 = vweird.f32 %v2003_v8 }
 0x3c3   : > { %v1986_v10 = vpop.f32.mrf.mxu3  ;;  %v2019_v27 = vor.u32 1.1754944e-38, %v2018_v30  ;;  %vm2017_vm5 = vcmp.eq.f32.partialorder %v2016_v33, 8.507059e+37 }
 0x3c4   : > { %v4816_v23 = vadd.f32 %v3603_v15, %v1986_v10 }
 0x3c6   : > { %v3626_v11 = vpop.eup %3625  ;;  %v3154_v24 = vmul.f32 -1.442695, %v4816_v23 }
 0x3c7   : > { %v3628_v25 = vpop.eup %3627  ;;  %v2004_v26 = vadd.f32 1.0, %v3626_v11 }
 0x3c8   : > { %v2008_v28 = vmul.f32 %v3628_v25, %v2003_v8  ;;  %3629 = vpow2.f32 %v3154_v24  ;;  %vm2013_vm2 = vweird.f32 %v3628_v25 }
 0x3c9   : > { %3631 = vrcp.f32 %v2004_v26  ;;  %vm2014_vm4 = vmor %vm2012_vm3, %vm2013_vm2  ;;  %v2031_v53 = vand.u32 2147483647, %v2004_v26  ;;  %v2033_v54 = vand.u32 2147483648, %v2004_v26  ;;  %vm2027_vm7 = vweird.f32 %v2004_v26 }
 0x3ca   : > { %v2009_v29 = vsub.f32 1.0, %v2008_v28 }
 0x3cb   : > { %v1988_v31 = vpop.f32.mrf.mxu3  ;;  %v2034_v61 = vor.u32 1.1754944e-38, %v2033_v54  ;;  %vm2032_vm9 = vcmp.eq.f32.partialorder %v2031_v53, 8.507059e+37  ;;  %v3359_v54 = vld [vmem:[%s4578_s23 + $0x38] sm:$0xff] }
 0x3cc   : > { %v2010_v32 = vmul.f32 %v3628_v25, %v2009_v29  ;;  %v4819_v35 = vadd.f32 %v3603_v15, %v1988_v31  ;;  %v2100_v29 = vstv %s2099_s26  ;;  %2283 = vmatpush.bf16.msrb.mxu1 %v3359_v54 }
 0x3ce   : > { %v3630_v42 = vpop.eup %3629  ;;  %v2011_v43 = vadd.f32 %v3628_v25, %v2010_v32  ;;  %v3155_v44 = vmul.f32 -1.442695, %v4819_v35 }
 0x3cf   : > { %v3632_v36 = vpop.eup %3631  ;;  %v2005_v46 = vadd.f32 1.0, %v3630_v42 }
 0x3d0   : > { %v2015_v47 = vsel %vm2014_vm4, %v3628_v25, %v2011_v43  ;;  %v2023_v48 = vmul.f32 %v3632_v36, %v2004_v26  ;;  %3633 = vpow2.f32 %v3155_v44  ;;  %vm2028_vm6 = vweird.f32 %v3632_v36 }
 0x3d1   : > { %v2020_v50 = vsel %vm2017_vm5, %v2019_v27, %v2015_v47  ;;  %3635 = vrcp.f32 %v2005_v46  ;;  %vm2029_vm8 = vmor %vm2027_vm7, %vm2028_vm6  ;;  %v2046_v0 = vand.u32 2147483647, %v2005_v46  ;;  %v2048_v2 = vand.u32 2147483648, %v2005_v46 }
 0x3d2   : > { %v4829_v51 = vmul.f32 %v2020_v50, %v1982_v17  ;;  %v2024_v52 = vsub.f32 1.0, %v2023_v48  ;;  %vm2042_vm11 = vweird.f32 %v2005_v46 }
 0x3d3   : > { %v2049_v13 = vor.u32 1.1754944e-38, %v2048_v2  ;;  %vm2047_vm13 = vcmp.eq.f32.partialorder %v2046_v0, 8.507059e+37 }
 0x3d4   : > { %v2075_v55 = vadd.f32 %v4829_v51, %v4774_v34  ;;  %v2025_v56 = vmul.f32 %v3632_v36, %v2024_v52  ;;  %v2087_v57 = vmul.f32 %v4827_v49, %v4829_v51 }
 0x3d6   : > { %v3634_v37 = vpop.eup %3633  ;;  %2079 = vst [vmem:[#allocation3 + $0x8] sm:$0xff] %v2075_v55  ;;  %v2026_v59 = vadd.f32 %v3632_v36, %v2025_v56  ;;  %2091 = vadd.xlane.f32.xlu1 %v2087_v57 }
 0x3d7   : > { %v3636_v60 = vpop.eup %3635  ;;  %v2006_v38 = vadd.f32 1.0, %v3634_v37 }
 0x3d8   : > { %v2030_v62 = vsel %vm2029_vm8, %v3632_v36, %v2026_v59  ;;  %v2038_v63 = vmul.f32 %v3636_v60, %v2005_v46  ;;  %vm2043_vm10 = vweird.f32 %v3636_v60 }
 0x3d9   : > { %v2035_v1 = vsel %vm2032_vm9, %v2034_v61, %v2030_v62  ;;  %3637 = vrcp.f32 %v2006_v38  ;;  %vm2044_vm12 = vmor %vm2042_vm11, %vm2043_vm10  ;;  %v2061_v18 = vand.u32 2147483647, %v2006_v38  ;;  %v2063_v19 = vand.u32 2147483648, %v2006_v38 }
 0x3da   : > { %v4835_v34 = vmul.f32 %v2035_v1, %v1984_v20  ;;  %v2039_v58 = vsub.f32 1.0, %v2038_v63  ;;  %vm2057_vm15 = vweird.f32 %v2006_v38  ;;  %v3357_v1 = vld [vmem:[%s4578_s23 + $0x28] sm:$0xff] }
 0x3db   : > { %v2064_v10 = vor.u32 1.1754944e-38, %v2063_v19  ;;  %vm2062_vm1 = vcmp.eq.f32.partialorder %v2061_v18, 8.507059e+37 }
 0x3dc   : > { %v2076_v3 = vadd.f32 %v4835_v34, %v4776_v39  ;;  %v2040_v5 = vmul.f32 %v3636_v60, %v2039_v58  ;;  %v2088_v45 = vmul.f32 %v4827_v49, %v4835_v34 }
 0x3de   : > { %2080 = vst [vmem:[#allocation3 + $0x10] sm:$0xff] %v2076_v3  ;;  %v2041_v9 = vadd.f32 %v3636_v60, %v2040_v5  ;;  %2093 = vadd.xlane.f32.xlu1 %v2088_v45  ;;  %v3356_v5 = vld [vmem:[%s4578_s23 + $0x20] sm:$0xff] }
 0x3df   : > { %v3638_v12 = vpop.eup %3637 }
 0x3e0   : > { %v2045_v14 = vsel %vm2044_vm12, %v3636_v60, %v2041_v9  ;;  %v2053_v15 = vmul.f32 %v3638_v12, %v2006_v38  ;;  %vm2058_vm14 = vweird.f32 %v3638_v12  ;;  %v3358_v60 = vld [vmem:[%s4578_s23 + $0x30] sm:$0xff] }
 0x3e1   : > { %v2050_v16 = vsel %vm2047_vm13, %v2049_v13, %v2045_v14  ;;  %vm2059_vm0 = vmor %vm2057_vm15, %vm2058_vm14  ;;  %2284 = vmatpush.bf16.msrb.mxu1 %v3358_v60  ;;  %v3605_v60 = vld [vmem:[%s1102_s14] ss:$0 sm:$0xff] }
 0x3e2   : > { %v4842_v17 = vmul.f32 %v2050_v16, %v4816_v23  ;;  %v2054_v39 = vsub.f32 1.0, %v2053_v15 }
 0x3e4   : > { %v2077_v20 = vadd.f32 %v4842_v17, %v4780_v40  ;;  %v2055_v21 = vmul.f32 %v3638_v12, %v2054_v39  ;;  %v2089_v22 = vmul.f32 %v4827_v49, %v4842_v17 }
 0x3e5   : > { %2285 = vmatpush.bf16.msrb.mxu1 %v3357_v1  ;;  %v3361_v1 = vld [vmem:[%s4580_s28 + $0x8] sm:$0xff] }
 0x3e6   : > { %2081 = vst [vmem:[#allocation3] sm:$0xff] %v2077_v20  ;;  %v2056_v8 = vadd.f32 %v3638_v12, %v2055_v21  ;;  %2095 = vadd.xlane.f32.xlu0 %v2089_v22  ;;  %v3355_v21 = vld [vmem:[%s4578_s23 + $0x18] sm:$0xff] }
 0x3e8   : > { %v2060_v23 = vsel %vm2059_vm0, %v3638_v12, %v2056_v8 }
 0x3e9   : > { %v2065_v11 = vsel %vm2062_vm1, %v2064_v10, %v2060_v23  ;;  %2286 = vmatpush.bf16.msrb.mxu1 %v3356_v5 }
 0x3ea   : > { %v4849_v24 = vmul.f32 %v2065_v11, %v4819_v35 }
 0x3ec   : > { %v2074_v40 = vmul.f32 %v4606_v4, %v4849_v24  ;;  %v2090_v25 = vmul.f32 %v4827_v49, %v4849_v24 }
 0x3ed   : > { %2287 = vmatpush.bf16.msrb.mxu1 %v3355_v21 }
 0x3ee   : > { %v2078_v26 = vadd.f32 %v2074_v40, %v4782_v41  ;;  %2097 = vadd.xlane.f32.xlu0 %v2090_v25 }
 0x3f0   : > { %2082 = vst [vmem:[#allocation3 + $0x18] sm:$0xff] %v2078_v26 }
 0x449   : > { %v2092_v28 = vpop.xlane.xlu1 %2091 }
 0x44a   : > { %v2101_v30 = vadd.f32 %v2100_v29, %v2092_v28 }
 0x44c   : > { %v3156_v33 = vmul.f32 -1.442695, %v2101_v30 }
 0x451   : > { %v2094_v31 = vpop.xlane.xlu1 %2093 }
 0x452   : > { %v2102_v32 = vadd.f32 %v2100_v29, %v2094_v31 }
 0x454   : > { %v3157_v42 = vmul.f32 -1.442695, %v2102_v32 }
 0x456   : > { %3639 = vpow2.f32 %v3157_v42 }
 0x457   : > { %3641 = vpow2.f32 %v3156_v33 }
 0x459   : > { %v2096_v35 = vpop.xlane.xlu0 %2095 }
 0x45a   : > { %v2103_v43 = vadd.f32 %v2100_v29, %v2096_v35 }
 0x45c   : > { %v3640_v4 = vpop.eup %3639  ;;  %v3158_v44 = vmul.f32 -1.442695, %v2103_v43 }
 0x45d   : > { %v3642_v36 = vpop.eup %3641  ;;  %v4857_v41 = vadd.f32 1.0, %v3640_v4 }
 0x45e   : > { %3643 = vpow2.f32 %v3158_v44  ;;  %v4859_v27 = vadd.f32 1.0, %v3642_v36 }
 0x45f   : > { %3645 = vrcp.f32 %v4857_v41  ;;  %vm2141_vm4 = vweird.f32 %v4857_v41  ;;  %v2145_v19 = vand.u32 2147483647, %v4857_v41  ;;  %v2147_v20 = vand.u32 2147483648, %v4857_v41 }
 0x460   : > { %3647 = vrcp.f32 %v4859_v27  ;;  %vm2126_vm9 = vweird.f32 %v4859_v27  ;;  %v2130_v11 = vand.u32 2147483647, %v4859_v27  ;;  %v2132_v40 = vand.u32 2147483648, %v4859_v27 }
 0x461   : > { %v2098_v46 = vpop.xlane.xlu0 %2097  ;;  %v2148_v32 = vor.u32 1.1754944e-38, %v2147_v20  ;;  %vm2146_vm0 = vcmp.eq.f32.partialorder %v2145_v19, 8.507059e+37 }
 0x462   : > { %v2104_v47 = vadd.f32 %v2100_v29, %v2098_v46  ;;  %v2133_v43 = vor.u32 1.1754944e-38, %v2132_v40  ;;  %vm2131_vm1 = vcmp.eq.f32.partialorder %v2130_v11, 8.507059e+37 }
 0x464   : > { %v3644_v48 = vpop.eup %3643  ;;  %v3159_v49 = vmul.f32 -1.442695, %v2104_v47 }
 0x465   : > { %v2119_v50 = vadd.f32 1.0, %v3644_v48  ;;  %v4863_v52 = vpop.eup %3645 }
 0x466   : > { %3649 = vpow2.f32 %v3159_v49  ;;  %v4865_v53 = vpop.eup %3647  ;;  %v2137_v56 = vmul.f32 %v4863_v52, %v4857_v41  ;;  %vm2142_vm5 = vweird.f32 %v4863_v52  ;;  %v3351_v49 = vld [vmem:[#allocation4] sm:$0xff] }
 0x467   : > { %3651 = vrcp.f32 %v2119_v50  ;;  %v2122_v59 = vmul.f32 %v4865_v53, %v4859_v27  ;;  %v2162_v12 = vand.u32 2147483648, %v2119_v50  ;;  %vm2127_vm3 = vweird.f32 %v4865_v53  ;;  %vm4898_vm10 = vmor %vm2141_vm4, %vm2142_vm5 }
 0x468   : > { %v2138_v62 = vsub.f32 1.0, %v2137_v56  ;;  %vm2156_vm6 = vweird.f32 %v2119_v50  ;;  %v2160_v13 = vand.u32 2147483647, %v2119_v50  ;;  %vm4904_vm13 = vmor %vm2126_vm9, %vm2127_vm3  ;;  %v3366_v56 = vld [vmem:[%s4580_s28 + $0x30] sm:$0xff] }
 0x469   : > { %v2123_v63 = vsub.f32 1.0, %v2122_v59  ;;  %v2163_v23 = vor.u32 1.1754944e-38, %v2162_v12  ;;  %v3363_v59 = vld [vmem:[%s4580_s28 + $0x18] sm:$0xff] }
 0x46a   : > { %v2139_v0 = vmul.f32 %v4863_v52, %v2138_v62  ;;  %vm2161_vm11 = vcmp.eq.f32.partialorder %v2160_v13, 8.507059e+37 }
 0x46b   : > { %v2124_v3 = vmul.f32 %v4865_v53, %v2123_v63 }
 0x46c   : > { %v3650_v55 = vpop.eup %3649  ;;  %v2140_v15 = vadd.f32 %v4863_v52, %v2139_v0 }
 0x46d   : > { %v3652_v57 = vpop.eup %3651  ;;  %v2120_v37 = vadd.f32 1.0, %v3650_v55  ;;  %v2125_v18 = vadd.f32 %v4865_v53, %v2124_v3  ;;  %v3367_v55 = vld [vmem:[%s4580_s28 + $0x38] sm:$0xff] }
 0x46e   : > { %v2152_v61 = vmul.f32 %v3652_v57, %v2119_v50  ;;  %vm2157_vm2 = vweird.f32 %v3652_v57  ;;  %v2144_v29 = vsel %vm4898_vm10, %v4863_v52, %v2140_v15  ;;  %v3354_v50 = vld [vmem:[%s4578_s23 + $0x10] sm:$0xff]  ;;  %2406 = vmatpush.bf16.msra.mxu2 %v3367_v55 }
 0x46f   : > { %3653 = vrcp.f32 %v2120_v37  ;;  %vm4881_vm7 = vmor %vm2156_vm6, %vm2157_vm2  ;;  %v2177_v39 = vand.u32 2147483648, %v2120_v37  ;;  %v2175_v10 = vand.u32 2147483647, %v2120_v37  ;;  %vm2171_vm12 = vweird.f32 %v2120_v37  ;;  %2288 = vmatpush.bf16.msrb.mxu1 %v3354_v50 }
 0x470   : > { %v2153_v38 = vsub.f32 1.0, %v2152_v61  ;;  %v2129_v42 = vsel %vm4904_vm13, %v4865_v53, %v2125_v18  ;;  %v2149_v4 = vsel %vm2146_vm0, %v2148_v32, %v2144_v29  ;;  %vm2196_vm2 = vcmask 261120   ;;  %v3362_v61 = vld [vmem:[%s4580_s28 + $0x10] sm:$0xff] }
 0x471   : > { %v2178_v31 = vor.u32 1.1754944e-38, %v2177_v39  ;;  %vm2176_vm15 = vcmp.eq.f32.partialorder %v2175_v10, 8.507059e+37  ;;  %v2134_v41 = vsel %vm2131_vm1, %v2133_v43, %v2129_v42  ;;  %v2182_v46 = vmul.f32 %v2149_v4, %v4835_v34  ;;  %v3606_v42 = vld [vmem:[%s1105_s12] ss:$0 sm:$0xff] }
 0x472   : > { %v2154_v58 = vmul.f32 %v3652_v57, %v2153_v38  ;;  %v2181_v47 = vmul.f32 %v2134_v41, %v4829_v51  ;;  %2407 = vmatpush.bf16.msra.mxu2 %v3366_v56 }
 0x474   : > { %v2155_v45 = vadd.f32 %v3652_v57, %v2154_v58  ;;  %v2187_v48 = vpack.c.bf16 %v2182_v46, %v2181_v47  ;;  %v3360_v58 = vld [vmem:[%s4580_s28] sm:$0xff] }
 0x475   : > { %v3654_v2 = vpop.eup %3653 }
 0x476   : > { %v2167_v9 = vmul.f32 %v3654_v2, %v2120_v37  ;;  %v2159_v22 = vsel %vm4881_vm7, %v3652_v57, %v2155_v45  ;;  %vm2172_vm8 = vweird.f32 %v3654_v2  ;;  %v3365_v57 = vld [vmem:[%s4580_s28 + $0x28] sm:$0xff]  ;;  %v3364_v37 = vld [vmem:[%s4580_s28 + $0x20] sm:$0xff] }
 0x477   : > { %v2164_v30 = vsel %vm2161_vm11, %v2163_v23, %v2159_v22  ;;  %vm2173_vm14 = vmor %vm2171_vm12, %vm2172_vm8  ;;  %2408 = vmatpush.bf16.msra.mxu2 %v3365_v57 }
 0x478   : > { %v2168_v14 = vsub.f32 1.0, %v2167_v9  ;;  %v2183_v44 = vmul.f32 %v2164_v30, %v4842_v17  ;;  %v3353_v17 = vld [vmem:[%s4578_s23 + $0x8] sm:$0xff] }
 0x479   : > { %2289 = vmatpush.bf16.msrb.mxu1 %v3353_v17 }
 0x47a   : > { %v2169_v8 = vmul.f32 %v3654_v2, %v2168_v14 }
 0x47b   : > { %2409 = vmatpush.bf16.msra.mxu2 %v3364_v37 }
 0x47c   : > { %v2170_v26 = vadd.f32 %v3654_v2, %v2169_v8 }
 0x47e   : > { %v2174_v33 = vsel %vm2173_vm14, %v3654_v2, %v2170_v26 }
 0x47f   : > { %v2179_v35 = vsel %vm2176_vm15, %v2178_v31, %v2174_v33  ;;  %2410 = vmatpush.bf16.msra.mxu2 %v3363_v59 }
 0x480   : > { %v2184_v36 = vmul.f32 %v2179_v35, %v4849_v24  ;;  %v3352_v24 = vld [vmem:[%s4578_s23] sm:$0xff] }
 0x481   : > { %2290 = vmatpush.bf16.msrb.mxu1 %v3352_v24 }
 0x482   : > { %v2188_v27 = vpack.c.bf16 %v2184_v36, %v2183_v44 }
 0x483   : > { %2411 = vmatpush.bf16.msra.mxu2 %v3362_v61 }
 0x484   : > { %2206 = vmatpush.bf16.msrb.mxu0 %v2188_v27 }
 0x487   : > { %2412 = vmatpush.bf16.msra.mxu2 %v3361_v1 }
 0x488   : > { %2207 = vmatpush.bf16.msrb.mxu0 %v2187_v48 }
 0x48b   : > { %3164 = vmatmul.msk.bf16.vlgmr.msrb.gmra.mxu0 %vm2196_vm2, %v3351_v49  ;;  %2413 = vmatpush.bf16.msra.mxu2 %v3360_v58 }
 0x508   : > { %v2209_v34 = vpop.f32.mrf.mxu0 }
 0x509   : > { %v2210_v51 = vadd.f32 %v2209_v34, %v4744_v6 }
 0x510   : > { %v2211_v52 = vpop.f32.mrf.mxu0 }
 0x511   : > { %v2212_v53 = vadd.f32 %v2211_v52, %v4746_v7 }
 0x513   : > { %v2214_v54 = vpack.c.bf16 %v2212_v53, %v2210_v51 }
 0x515   : > { %2291 = vmatmul.bf16.vlgmr.msrb.gmra.mxu1 %v2214_v54 }
 0x592   : > { %v2292_v38 = vpop.f32.mrf.mxu1 }
 0x593   : > { %v2293_v62 = vadd.f32 %v3605_v60, %v2292_v38 }
 0x595   : > { %v3197_v63 = vmul.f32 -1.442695, %v2293_v62 }
 0x597   : > { %3655 = vpow2.f32 %v3197_v63 }
 0x59a   : > { %v2294_v0 = vpop.f32.mrf.mxu1 }
 0x59b   : > { %v2295_v2 = vadd.f32 %v3605_v60, %v2294_v0 }
 0x59d   : > { %v3656_v3 = vpop.eup %3655  ;;  %v3198_v5 = vmul.f32 -1.442695, %v2295_v2 }
 0x59e   : > { %v2303_v45 = vadd.f32 1.0, %v3656_v3 }
 0x59f   : > { %3657 = vpow2.f32 %v3198_v5 }
 0x5a0   : > { %3659 = vrcp.f32 %v2303_v45  ;;  %v2316_v20 = vand.u32 2147483648, %v2303_v45  ;;  %vm2310_vm4 = vweird.f32 %v2303_v45  ;;  %v2314_v21 = vand.u32 2147483647, %v2303_v45 }
 0x5a2   : > { %v2317_v40 = vor.u32 1.1754944e-38, %v2316_v20  ;;  %vm2315_vm7 = vcmp.eq.f32.partialorder %v2314_v21, 8.507059e+37 }
 0x5a5   : > { %v3658_v9 = vpop.eup %3657 }
 0x5a6   : > { %v3660_v12 = vpop.eup %3659  ;;  %v2304_v13 = vadd.f32 1.0, %v3658_v9 }
 0x5a7   : > { %v2306_v14 = vmul.f32 %v3660_v12, %v2303_v45  ;;  %vm2311_vm3 = vweird.f32 %v3660_v12 }
 0x5a8   : > { %3661 = vrcp.f32 %v2304_v13  ;;  %vm2312_vm5 = vmor %vm2310_vm4, %vm2311_vm3  ;;  %v2331_v8 = vand.u32 2147483648, %v2304_v13  ;;  %v2329_v11 = vand.u32 2147483647, %v2304_v13  ;;  %vm2325_vm8 = vweird.f32 %v2304_v13 }
 0x5a9   : > { %v2307_v15 = vsub.f32 1.0, %v2306_v14 }
 0x5aa   : > { %v2332_v28 = vor.u32 1.1754944e-38, %v2331_v8  ;;  %vm2330_vm10 = vcmp.eq.f32.partialorder %v2329_v11, 8.507059e+37 }
 0x5ab   : > { %v2308_v16 = vmul.f32 %v3660_v12, %v2307_v15 }
 0x5ad   : > { %v2309_v18 = vadd.f32 %v3660_v12, %v2308_v16 }
 0x5ae   : > { %v3662_v39 = vpop.eup %3661 }
 0x5af   : > { %v2321_v19 = vmul.f32 %v3662_v39, %v2304_v13  ;;  %v2313_v10 = vsel %vm2312_vm5, %v3660_v12, %v2309_v18  ;;  %vm2326_vm6 = vweird.f32 %v3662_v39 }
 0x5b0   : > { %v2318_v26 = vsel %vm2315_vm7, %v2317_v40, %v2313_v10  ;;  %vm2327_vm9 = vmor %vm2325_vm8, %vm2326_vm6 }
 0x5b1   : > { %v2322_v22 = vsub.f32 1.0, %v2321_v19  ;;  %v2335_v31 = vmul.f32 %v2318_v26, %v2293_v62 }
 0x5b3   : > { %v2323_v23 = vmul.f32 %v3662_v39, %v2322_v22 }
 0x5b5   : > { %v2324_v25 = vadd.f32 %v3662_v39, %v2323_v23 }
 0x5b7   : > { %v2328_v29 = vsel %vm2327_vm9, %v3662_v39, %v2324_v25 }
 0x5b8   : > { %v2333_v30 = vsel %vm2330_vm10, %v2332_v28, %v2328_v29 }
 0x5b9   : > { %v2336_v32 = vmul.f32 %v2333_v30, %v2295_v2 }
 0x5bb   : > { %v2337_v33 = vpack.c.bf16 %v2336_v32, %v2335_v31 }
 0x5bd   : > { %2414 = vmatmul.bf16.vlgmr.msra.gmra.mxu2 %v2337_v33 }
 0x640   : > { %v2415_v35 = vpop.f32.mrf.mxu2 }
 0x641   : > { %v2416_v43 = vadd.f32 %v3606_v42, %v2415_v35 }
 0x643   : > { %v2420_v4 = vadd.f32 %v2416_v43, %v4744_v6 }
 0x645   : > { %2422 = vst [vmem:[#allocation2] sm:$0xff] %v2420_v4 }
 0x648   : > { %v2417_v44 = vpop.f32.mrf.mxu2 }
 0x649   : > { %v2418_v36 = vadd.f32 %v3606_v42, %v2417_v44  ;;  %2427 = sbr.rel (%p3231_p3) target bundleno = 1951 (0x79f), region = 180 }
 0x64b   : > { %v2421_v41 = vadd.f32 %v2418_v36, %v4746_v7 }
 0x64d   : > { %2423 = vst [vmem:[#allocation2 + $0x8] sm:$0xff] %v2421_v41 }
 0x64e   : > { %v3375_v27 = vld [vmem:[#allocation13 + $0x38] sm:$0xff]  ;;  %v3374_v46 = vld [vmem:[#allocation13 + $0x30] sm:$0xff]  ;;  %v3373_v47 = vld [vmem:[#allocation13 + $0x28] sm:$0xff] }
 0x64f   : > { %2499 = vmatpush.bf16.msra.mxu0 %v3375_v27  ;;  %v3372_v48 = vld [vmem:[#allocation13 + $0x20] sm:$0xff]  ;;  %v3371_v49 = vld [vmem:[#allocation13 + $0x18] sm:$0xff]  ;;  %v3370_v6 = vld [vmem:[#allocation13 + $0x10] sm:$0xff] }
 0x650   : > { %v3369_v50 = vld [vmem:[#allocation13 + $0x8] sm:$0xff]  ;;  %v3368_v17 = vld [vmem:[#allocation13] sm:$0xff]  ;;  %v3382_v51 = vld [vmem:[#allocation16 + $0x30] sm:$0xff] }
 0x651   : > { %v2428_v7 = vld [vmem:[#allocation2] sm:$0xff]  ;;  %v3383_v52 = vld [vmem:[#allocation16 + $0x38] sm:$0xff]  ;;  %v3381_v53 = vld [vmem:[#allocation16 + $0x28] sm:$0xff] }
 0x652   : > { %2622 = vmatpush.bf16.msra.mxu1 %v3383_v52  ;;  %v3380_v54 = vld [vmem:[#allocation16 + $0x20] sm:$0xff]  ;;  %v3379_v55 = vld [vmem:[#allocation16 + $0x18] sm:$0xff]  ;;  %v3378_v57 = vld [vmem:[#allocation16 + $0x10] sm:$0xff] }
 0x653   : > { %2500 = vmatpush.bf16.msra.mxu0 %v3374_v46  ;;  %v3663_v56 = vld [vmem:[#allocation14] ss:$0 sm:$0xff]  ;;  %v3377_v60 = vld [vmem:[#allocation16 + $0x8] sm:$0xff]  ;;  %v3376_v38 = vld [vmem:[#allocation16] sm:$0xff] }
 0x654   : > { %v2429_v24 = vld [vmem:[#allocation2 + $0x8] sm:$0xff]  ;;  %v3664_v30 = vld [vmem:[#allocation17] ss:$0 sm:$0xff] }
 0x655   : > { %v2430_v34 = vpack.c.bf16 %v2429_v24, %v2428_v7 }
 0x656   : > { %2623 = vmatpush.bf16.msra.mxu1 %v3382_v51 }
 0x657   : > { %2501 = vmatpush.bf16.msra.mxu0 %v3373_v47 }
 0x65a   : > { %2624 = vmatpush.bf16.msra.mxu1 %v3381_v53 }
 0x65b   : > { %2502 = vmatpush.bf16.msra.mxu0 %v3372_v48 }
 0x65e   : > { %2625 = vmatpush.bf16.msra.mxu1 %v3380_v54 }
 0x65f   : > { %2503 = vmatpush.bf16.msra.mxu0 %v3371_v49 }
 0x662   : > { %2626 = vmatpush.bf16.msra.mxu1 %v3379_v55 }
 0x663   : > { %2504 = vmatpush.bf16.msra.mxu0 %v3370_v6 }
 0x666   : > { %2627 = vmatpush.bf16.msra.mxu1 %v3378_v57 }
 0x667   : > { %2505 = vmatpush.bf16.msra.mxu0 %v3369_v50 }
 0x66a   : > { %2628 = vmatpush.bf16.msra.mxu1 %v3377_v60 }
 0x66b   : > { %2506 = vmatpush.bf16.msra.mxu0 %v3368_v17 }
 0x66e   : > { %2507 = vmatmul.bf16.vlgmr.msra.gmra.mxu0 %v2430_v34  ;;  %2629 = vmatpush.bf16.msra.mxu1 %v3376_v38 }
 0x6eb   : > { %v2508_v37 = vpop.f32.mrf.mxu0 }
 0x6ec   : > { %v2509_v59 = vadd.f32 %v3663_v56, %v2508_v37 }
 0x6ee   : > { %v3264_v61 = vmul.f32 -1.442695, %v2509_v59 }
 0x6f0   : > { %3665 = vpow2.f32 %v3264_v61 }
 0x6f3   : > { %v2510_v62 = vpop.f32.mrf.mxu0 }
 0x6f4   : > { %v2511_v63 = vadd.f32 %v3663_v56, %v2510_v62 }
 0x6f6   : > { %v3666_v1 = vpop.eup %3665  ;;  %v3265_v58 = vmul.f32 -1.442695, %v2511_v63 }
 0x6f7   : > { %v2519_v0 = vadd.f32 1.0, %v3666_v1 }
 0x6f8   : > { %3667 = vpow2.f32 %v3265_v58 }
 0x6f9   : > { %3669 = vrcp.f32 %v2519_v0  ;;  %v2532_v16 = vand.u32 2147483648, %v2519_v0  ;;  %vm2526_vm12 = vweird.f32 %v2519_v0  ;;  %v2530_v39 = vand.u32 2147483647, %v2519_v0 }
 0x6fb   : > { %v2533_v8 = vor.u32 1.1754944e-38, %v2532_v16  ;;  %vm2531_vm15 = vcmp.eq.f32.partialorder %v2530_v39, 8.507059e+37 }
 0x6fe   : > { %v3668_v2 = vpop.eup %3667 }
 0x6ff   : > { %v3670_v3 = vpop.eup %3669  ;;  %v2520_v5 = vadd.f32 1.0, %v3668_v2 }
 0x700   : > { %v2522_v45 = vmul.f32 %v3670_v3, %v2519_v0  ;;  %vm2527_vm11 = vweird.f32 %v3670_v3 }
 0x701   : > { %3671 = vrcp.f32 %v2520_v5  ;;  %vm2528_vm13 = vmor %vm2526_vm12, %vm2527_vm11  ;;  %v2547_v19 = vand.u32 2147483648, %v2520_v5  ;;  %v2545_v22 = vand.u32 2147483647, %v2520_v5  ;;  %vm2541_vm0 = vweird.f32 %v2520_v5 }
 0x702   : > { %v2523_v9 = vsub.f32 1.0, %v2522_v45 }
 0x703   : > { %v2548_v11 = vor.u32 1.1754944e-38, %v2547_v19  ;;  %vm2546_vm2 = vcmp.eq.f32.partialorder %v2545_v22, 8.507059e+37 }
 0x704   : > { %v2524_v12 = vmul.f32 %v3670_v3, %v2523_v9 }
 0x706   : > { %v2525_v14 = vadd.f32 %v3670_v3, %v2524_v12 }
 0x707   : > { %v3672_v13 = vpop.eup %3671 }
 0x708   : > { %v2537_v15 = vmul.f32 %v3672_v13, %v2520_v5  ;;  %v2529_v20 = vsel %vm2528_vm13, %v3670_v3, %v2525_v14  ;;  %vm2542_vm14 = vweird.f32 %v3672_v13 }
 0x709   : > { %v2534_v23 = vsel %vm2531_vm15, %v2533_v8, %v2529_v20  ;;  %vm2543_vm1 = vmor %vm2541_vm0, %vm2542_vm14 }
 0x70a   : > { %v2538_v18 = vsub.f32 1.0, %v2537_v15  ;;  %v2551_v26 = vmul.f32 %v2534_v23, %v2509_v59 }
 0x70c   : > { %v2539_v21 = vmul.f32 %v3672_v13, %v2538_v18 }
 0x70e   : > { %v2540_v10 = vadd.f32 %v3672_v13, %v2539_v21 }
 0x710   : > { %v2544_v40 = vsel %vm2543_vm1, %v3672_v13, %v2540_v10 }
 0x711   : > { %v2549_v25 = vsel %vm2546_vm2, %v2548_v11, %v2544_v40 }
 0x712   : > { %v2552_v28 = vmul.f32 %v2549_v25, %v2511_v63 }
 0x714   : > { %v2553_v29 = vpack.c.bf16 %v2552_v28, %v2551_v26 }
 0x716   : > { %2630 = vmatmul.bf16.vlgmr.msra.gmra.mxu1 %v2553_v29 }
 0x793   : > { %v2631_v31 = vpop.f32.mrf.mxu1 }
 0x794   : > { %v2632_v32 = vadd.f32 %v3664_v30, %v2631_v31 }
 0x796   : > { %2636 = vst [vmem:[#allocation25] sm:$0xff] %v2632_v32 }
 0x79b   : > { %v2633_v33 = vpop.f32.mrf.mxu1 }
 0x79c   : > { %v2634_v42 = vadd.f32 %v3664_v30, %v2633_v33 }
 0x79e   : > { %2637 = vst [vmem:[#allocation25 + $0x8] sm:$0xff] %v2634_v42 }
 0x79f PF: > { %s5077_s12 = sld [smem:[#allocation36_spill]]  ;;  %s4185_s21 = smov [#allocation25]  }
 0x7a0   : > { %s2643_s18 = sshll.u32 %s4185_s21, 4  ;;  %s5078_s0 = sld [smem:[#allocation60_spill]]  ;;  %s2644_s18 = int_to_ptr.vmem [resolvable:$true] %s2643_s18 }
 0x7a1   : > { %s4186_s5 = smov 128   ;;  %s4187_s2 = smov 8  }
 0x7a5   : > { %p3497_p4 = scmp.eq.s32.totalorder %s5077_s12, 3 }
 0x7a6   : > { %s2645_s4 = sshll.u32 %s5078_s0, 4  ;;  %s2646_s4 = int_to_ptr.hbm [resolvable:$true] %s2645_s4 }
 0x7a7   : > { %3431 = dma.vmem_to_hbm [thread:$0]  (%p3497_p4), %s2644_s18, 256, %s2646_s4, [#allocation6], %s4186_s5, %s4186_s5, %s4187_s2  }
 0x7a8   : > { %4151 = dma.done.wait (%p3497_p4), [#allocation6], 256  }
 0x7a9   : > { %4153 = vsyncadd (%p3497_p4), [#allocation6], 4294967040 }
 0x7aa PF: > { %s5079_s28 = sld [smem:[#allocation37_spill]] }
 0x7ab   : > { %s5080_s5 = sld [smem:[#allocation34_spill]] }
 0x7ac   : > { %s5081_s26 = sld [smem:[#allocation35_spill]] }
 0x7ad   : > { %s5082_s27 = sld [smem:[#allocation38_spill]] }
 0x7b0   : > { %p38_p12 = scmp.ge.s32.totalorder %s5079_s28, 6  }
 0x7b2   :  { %40 = sbr.rel (!%p38_p12) target bundleno = 30 (0x1e), region = 256 }
 0x7b7   :  { %2662 = vsyncpa [#allocation5], 1 }
 0x7b8   :  { %2664 = vsyncpa [#allocation5 + $0x1], 1 }
 0x7b9   :  { %2665 = vsyncpa [#allocation9], 1 }
 0x7ba   :  { %2666 = vsyncpa [#allocation12], 1 }
 0x7bb   :  { %2667 = vsyncpa [#allocation15], 1 }
 0x7bc   :  { %2668 = vsyncpa [#allocation18], 1 }
 0x7bd   :  { %2669 = vsyncpa [#allocation6], 1 }
 0x7be   :  { %2671 = vsyncpa [#allocation6 + $0x1], 1 }
 0x7bf   :  { %2672 = vsyncpa [#allocation7], 1 }
 0x7c0   :  { %2674 = vsyncpa [#allocation7 + $0x1], 1 }

</bundles_post_ra>
